<compile_context>
chip_gen: v5e
topology: v5e:2x2
jax: 0.10.0
libtpu: 0.0.40
codegen_flags: <defaults>
</compile_context>

<pallas_src>
import functools
import math

import jax
import jax.numpy as jnp
from jax.experimental import pallas as pl
from jax.experimental.pallas import tpu as pltpu


def _round_up(x, m):
    return (x + m - 1) // m * m


def fib_kernel(p_ref, w_ref, b_ref, g_ref, beta_ref, o_ref, *, e_real, e_pad):
    # conv as matmul on the MXU (f32 accumulation regardless of input dtype)
    x = jnp.dot(p_ref[...], w_ref[...], preferred_element_type=jnp.float32)
    x = x + b_ref[...]
    # exact GELU (matches torch.nn.GELU() default, erf formulation)
    x = 0.5 * x * (1.0 + jax.lax.erf(x * (1.0 / math.sqrt(2.0))))
    # LayerNorm over the *real* embed dim only (padded lanes are exactly zero
    # because the padded weight columns and bias are zero, and GELU(0) == 0).
    inv_e = 1.0 / e_real
    mean = jnp.sum(x, axis=-1, keepdims=True) * inv_e
    if e_pad == e_real:
        xc = x - mean
    else:
        lane = jax.lax.broadcasted_iota(jnp.int32, (1, e_pad), 1)
        xc = jnp.where(lane < e_real, x - mean, 0.0)
    var = jnp.sum(xc * xc, axis=-1, keepdims=True) * inv_e
    y = (x - mean) * jax.lax.rsqrt(var + 1e-5)
    # padded gamma/beta are zero -> padded output lanes are zero (sliced off anyway)
    y = y * g_ref[...] + beta_ref[...]
    o_ref[...] = y.astype(o_ref.dtype)


def _im2col_nchw(x, kh, kw, stride, ph, pw):
    """Extract conv patches; returns (B*Ho*Wo, C*kh*kw), plus (Ho, Wo)."""
    B, C, H, W = x.shape
    Ho = (H + 2 * ph - kh) // stride + 1
    Wo = (W + 2 * pw - kw) // stride + 1
    xp = jnp.pad(x, ((0, 0), (0, 0), (ph, ph), (pw, pw)))
    cols = []
    for i in range(kh):
        for j in range(kw):
            cols.append(
                xp[:, :, i : i + stride * (Ho - 1) + 1 : stride,
                          j : j + stride * (Wo - 1) + 1 : stride]
            )  # (B, C, Ho, Wo)
    p = jnp.stack(cols, axis=2)                     # (B, C, kh*kw, Ho, Wo)
    p = p.reshape(B, C * kh * kw, Ho, Wo)           # feature idx = c*(kh*kw)+i*kw+j
    p = p.transpose(0, 2, 3, 1).reshape(B * Ho * Wo, C * kh * kw)
    return p, Ho, Wo


def feature_incentive_block(x, conv_w, conv_b, ln_g, ln_b, *, stride,
                            tm=512, input_dtype=None,
                            vmem_budget_bytes=48 << 20):
    """x: (B, C, H, W) NCHW. Returns ((B, Ho*Wo, E), Ho, Wo).

    input_dtype: optionally cast patches + conv weight (e.g. jnp.bfloat16) to halve
    HBM read traffic on v6e/v7x; accumulation and GELU/LN remain f32.
    """
    B, C, H, W = x.shape
    E, Cw, kh, kw = conv_w.shape
    assert Cw == C
    ph, pw = kh // 2, kw // 2

    patches, Ho, Wo = _im2col_nchw(x, kh, kw, stride, ph, pw)   # (N, K)
    N, K = patches.shape
    wmat = conv_w.reshape(E, K).T                                # (K, E)

    if input_dtype is not None:
        patches = patches.astype(input_dtype)
        wmat = wmat.astype(input_dtype)

    out_dtype = x.dtype
    in_bytes = jnp.dtype(patches.dtype).itemsize
    out_bytes = jnp.dtype(out_dtype).itemsize

    # 128-aligned contraction / embed dims -> dense lane loads + lane-dense stores.
    Kp = _round_up(K, 128)
    Ep = _round_up(E, 128)

    # Token tile: MXU-shaped (multiple of 128), capped by the VMEM budget (fits
    # v7x's 64 MiB VMEM) and by the (padded) token count.
    tm = _round_up(max(tm, 128), 128)
    per_row = 2 * Kp * in_bytes + 2 * Ep * out_bytes          # double-buffered in/out
    resident = 2 * Kp * Ep * in_bytes + 8 * Ep * 4            # weight + bias/LN vectors
    tm_cap = max(128, ((vmem_budget_bytes - resident) // per_row) // 128 * 128)
    # TODO(synk): if K*E is so large that the resident weight alone busts the budget,
    # add a K grid axis with a VMEM f32 accumulator instead of shrinking tm.
    tm = min(tm, tm_cap, _round_up(N, 128))

    Np = pl.cdiv(N, tm) * tm
    patches = jnp.pad(patches, ((0, Np - N), (0, Kp - K)))
    wmat = jnp.pad(wmat, ((0, Kp - K), (0, Ep - E)))
    bias = jnp.pad(conv_b.reshape(1, E).astype(jnp.float32), ((0, 0), (0, Ep - E)))
    gamma = jnp.pad(ln_g.reshape(1, E).astype(jnp.float32), ((0, 0), (0, Ep - E)))
    beta = jnp.pad(ln_b.reshape(1, E).astype(jnp.float32), ((0, 0), (0, Ep - E)))

    est_vmem = tm * per_row + resident
    vmem_limit = int(min(max(est_vmem + (4 << 20), 16 << 20), 56 << 20))

    out = pl.pallas_call(
        functools.partial(fib_kernel, e_real=E, e_pad=Ep),
        out_shape=jax.ShapeDtypeStruct((Np, Ep), out_dtype),
        grid_spec=pltpu.PrefetchScalarGridSpec(
            num_scalar_prefetch=0,
            grid=(Np // tm,),
            in_specs=[
                pl.BlockSpec((tm, Kp), lambda i: (i, 0)),   # patch tile
                pl.BlockSpec((Kp, Ep), lambda i: (0, 0)),   # conv weight (matmul form)
                pl.BlockSpec((1, Ep), lambda i: (0, 0)),    # conv bias
                pl.BlockSpec((1, Ep), lambda i: (0, 0)),    # LN gamma
                pl.BlockSpec((1, Ep), lambda i: (0, 0)),    # LN beta
            ],
            out_specs=pl.BlockSpec((tm, Ep), lambda i: (i, 0)),
        ),
        compiler_params=pltpu.CompilerParams(
            dimension_semantics=("parallel",),   # token axis shards across TCs (v7x)
            vmem_limit_bytes=vmem_limit,
        ),
    )(patches, wmat, bias, gamma, beta)

    out = out[:N, :E].reshape(B, Ho * Wo, E)
    return out, Ho, Wo


def _reference(x, conv_w, conv_b, ln_g, ln_b, *, stride):
    """Pure-JAX reference mirroring the PyTorch forward."""
    E, C, kh, kw = conv_w.shape
    y = jax.lax.conv_general_dilated(
        x, conv_w, window_strides=(stride, stride),
        padding=((kh // 2, kh // 2), (kw // 2, kw // 2)),
        dimension_numbers=("NCHW", "OIHW", "NCHW"),
    )
    y = y + conv_b[None, :, None, None]
    B, _, Ho, Wo = y.shape
    y = y.reshape(B, E, Ho * Wo).transpose(0, 2, 1)        # (B, N, E)
    y = 0.5 * y * (1.0 + jax.lax.erf(y * (1.0 / math.sqrt(2.0))))
    mean = y.mean(-1, keepdims=True)
    var = ((y - mean) ** 2).mean(-1, keepdims=True)
    y = (y - mean) / jnp.sqrt(var + 1e-5) * ln_g + ln_b
    return y, Ho, Wo


if __name__ == "__main__":
    # small shapes consistent with the module: patch_size=7, stride=4
    B, C, H, W = 2, 4, 16, 16
    E, kh, kw, stride = 32, 7, 7, 4

    key = jax.random.PRNGKey(0)
    kx, kw_key = jax.random.split(key)
    x = jax.random.normal(kx, (B, C, H, W), dtype=jnp.float32)

    # deterministic init matching _init_weights for Conv2d / LayerNorm
    fan_out = kh * kw * E
    conv_w = jax.random.normal(kw_key, (E, C, kh, kw), jnp.float32) * math.sqrt(2.0 / fan_out)
    conv_b = jnp.zeros((E,), jnp.float32)
    ln_g = jnp.ones((E,), jnp.float32)
    ln_b = jnp.zeros((E,), jnp.float32)

    ref, Ho_r, Wo_r = _reference(x, conv_w, conv_b, ln_g, ln_b, stride=stride)

    # f32 path (default): must match the PyTorch-equivalent reference tightly.
    out, Ho, Wo = feature_incentive_block(x, conv_w, conv_b, ln_g, ln_b, stride=stride)
    out = jax.block_until_ready(out)
    assert (Ho, Wo) == (Ho_r, Wo_r)
    assert out.shape == (B, Ho * Wo, E)
    assert jnp.allclose(out, ref, atol=1e-4, rtol=1e-4), float(jnp.max(jnp.abs(out - ref)))

    # bf16 input path (v6e/v7x memory-traffic optimization): loose tolerance check.
    out_bf16, _, _ = feature_incentive_block(
        x, conv_w, conv_b, ln_g, ln_b, stride=stride, input_dtype=jnp.bfloat16)
    out_bf16 = jax.block_until_ready(out_bf16)
    assert jnp.allclose(out_bf16, ref, atol=1e-1, rtol=1e-1), \
        float(jnp.max(jnp.abs(out_bf16 - ref)))

    print("KERNEL_OK")
</pallas_src>

<mosaic_0001>
module attributes {stable_mosaic.version = 11 : i64} {
  func.func @fib_kernel(%arg0: i32, %arg1: memref<128x256xf32, #tpu.memory_space<vmem>>, %arg2: memref<256x128xf32, #tpu.memory_space<vmem>>, %arg3: memref<1x128xf32, #tpu.memory_space<vmem>>, %arg4: memref<1x128xf32, #tpu.memory_space<vmem>>, %arg5: memref<1x128xf32, #tpu.memory_space<vmem>>, %arg6: memref<128x128xf32, #tpu.memory_space<vmem>>) attributes {dimension_semantics = [#tpu.dimension_semantics<parallel>], iteration_bounds = array<i64: 1>, scalar_prefetch = 0 : i64, scratch_operands = 0 : i64, tpu.core_type = #tpu.core_type<tc>, window_params = [{transform_indices = @transform_0, window_bounds = array<i64: 128, 256>}, {pipeline_mode = #tpu.pipeline_mode<synchronous>, transform_indices = @transform_1, window_bounds = array<i64: 256, 128>}, {pipeline_mode = #tpu.pipeline_mode<synchronous>, transform_indices = @transform_2, window_bounds = array<i64: 1, 128>}, {pipeline_mode = #tpu.pipeline_mode<synchronous>, transform_indices = @transform_3, window_bounds = array<i64: 1, 128>}, {pipeline_mode = #tpu.pipeline_mode<synchronous>, transform_indices = @transform_4, window_bounds = array<i64: 1, 128>}, {transform_indices = @transform_5, window_bounds = array<i64: 128, 128>}]} {
    %c0 = arith.constant 0 : index
    %c0_0 = arith.constant 0 : index
    %0 = vector.load %arg1[%c0, %c0_0] : memref<128x256xf32, #tpu.memory_space<vmem>>, vector<128x256xf32>
    %c0_1 = arith.constant 0 : index
    %c0_2 = arith.constant 0 : index
    %1 = vector.load %arg2[%c0_1, %c0_2] : memref<256x128xf32, #tpu.memory_space<vmem>>, vector<256x128xf32>
    %cst = arith.constant dense<0.000000e+00> : vector<128x128xf32>
    %2 = tpu.matmul %0, %1, %cst {dimension_numbers = #tpu.dot_dimension_numbers<[1], [0], [0], [1], [0, 0, 1, 1], [], []>} : vector<128x256xf32>, vector<256x128xf32>, vector<128x128xf32> -> vector<128x128xf32>
    %c0_3 = arith.constant 0 : index
    %c0_4 = arith.constant 0 : index
    %3 = vector.load %arg3[%c0_3, %c0_4] : memref<1x128xf32, #tpu.memory_space<vmem>>, vector<1x128xf32>
    %4 = vector.broadcast %3 : vector<1x128xf32> to vector<128x128xf32>
    %5 = arith.addf %2, %4 : vector<128x128xf32>
    %cst_5 = arith.constant 5.000000e-01 : f32
    %6 = vector.broadcast %cst_5 : f32 to vector<128x128xf32>
    %7 = arith.mulf %6, %5 : vector<128x128xf32>
    %cst_6 = arith.constant 0.707106769 : f32
    %8 = vector.broadcast %cst_6 : f32 to vector<128x128xf32>
    %9 = arith.mulf %5, %8 : vector<128x128xf32>
    %10 = math.erf %9 : vector<128x128xf32>
    %cst_7 = arith.constant 1.000000e+00 : f32
    %11 = vector.broadcast %cst_7 : f32 to vector<128x128xf32>
    %12 = arith.addf %11, %10 : vector<128x128xf32>
    %13 = arith.mulf %7, %12 : vector<128x128xf32>
    %cst_8 = arith.constant dense<0.000000e+00> : vector<128xf32>
    %14 = vector.multi_reduction <add>, %13, %cst_8 [1] : vector<128x128xf32> to vector<128xf32>
    %15 = vector.shape_cast %14 : vector<128xf32> to vector<128x1xf32>
    %cst_9 = arith.constant 3.125000e-02 : f32
    %16 = vector.broadcast %cst_9 : f32 to vector<128x1xf32>
    %17 = arith.mulf %15, %16 : vector<128x1xf32>
    %18 = tpu.iota {dimensions = array<i32: 1>} : vector<1x128xi32>
    %c32_i32 = arith.constant 32 : i32
    %19 = vector.broadcast %c32_i32 : i32 to vector<1x128xi32>
    %20 = arith.cmpi slt, %18, %19 : vector<1x128xi32>
    %21 = vector.broadcast %17 : vector<128x1xf32> to vector<128x128xf32>
    %22 = arith.subf %13, %21 : vector<128x128xf32>
    %cst_10 = arith.constant 0.000000e+00 : f32
    %23 = vector.shape_cast %20 : vector<1x128xi1> to vector<1x128xi1>
    %24 = vector.broadcast %23 : vector<1x128xi1> to vector<128x128xi1>
    %25 = vector.broadcast %cst_10 : f32 to vector<128x128xf32>
    %26 = arith.select %24, %22, %25 : vector<128x128xi1>, vector<128x128xf32>
    %27 = arith.mulf %26, %26 : vector<128x128xf32>
    %cst_11 = arith.constant dense<0.000000e+00> : vector<128xf32>
    %28 = vector.multi_reduction <add>, %27, %cst_11 [1] : vector<128x128xf32> to vector<128xf32>
    %29 = vector.shape_cast %28 : vector<128xf32> to vector<128x1xf32>
    %cst_12 = arith.constant 3.125000e-02 : f32
    %30 = vector.broadcast %cst_12 : f32 to vector<128x1xf32>
    %31 = arith.mulf %29, %30 : vector<128x1xf32>
    %32 = vector.broadcast %17 : vector<128x1xf32> to vector<128x128xf32>
    %33 = arith.subf %13, %32 : vector<128x128xf32>
    %cst_13 = arith.constant 9.99999974E-6 : f32
    %34 = vector.broadcast %cst_13 : f32 to vector<128x1xf32>
    %35 = arith.addf %31, %34 : vector<128x1xf32>
    %36 = math.rsqrt %35 : vector<128x1xf32>
    %37 = vector.broadcast %36 : vector<128x1xf32> to vector<128x128xf32>
    %38 = arith.mulf %33, %37 : vector<128x128xf32>
    %c0_14 = arith.constant 0 : index
    %c0_15 = arith.constant 0 : index
    %39 = vector.load %arg4[%c0_14, %c0_15] : memref<1x128xf32, #tpu.memory_space<vmem>>, vector<1x128xf32>
    %40 = vector.broadcast %39 : vector<1x128xf32> to vector<128x128xf32>
    %41 = arith.mulf %38, %40 : vector<128x128xf32>
    %c0_16 = arith.constant 0 : index
    %c0_17 = arith.constant 0 : index
    %42 = vector.load %arg5[%c0_16, %c0_17] : memref<1x128xf32, #tpu.memory_space<vmem>>, vector<1x128xf32>
    %43 = vector.broadcast %42 : vector<1x128xf32> to vector<128x128xf32>
    %44 = arith.addf %41, %43 : vector<128x128xf32>
    %c0_18 = arith.constant 0 : index
    %c0_19 = arith.constant 0 : index
    %45 = vector.load %arg6[%c0_18, %c0_19] : memref<128x128xf32, #tpu.memory_space<vmem>>, vector<128x128xf32>
    tpu.vector_store %arg6[%c0_18, %c0_19], %44 {strides = array<i32>} : memref<128x128xf32, #tpu.memory_space<vmem>>, vector<128x128xf32>,
    return
  }
  func.func @transform_0(%arg0: i32) -> (i32, i32) {
    %c0_i32 = arith.constant 0 : i32
    %c0_i32_0 = arith.constant 0 : i32
    return %arg0, %c0_i32 : i32, i32
  }
  func.func @transform_1(%arg0: i32) -> (i32, i32) {
    %c0_i32 = arith.constant 0 : i32
    %c0_i32_0 = arith.constant 0 : i32
    %c0_i32_1 = arith.constant 0 : i32
    return %c0_i32, %c0_i32_0 : i32, i32
  }
  func.func @transform_2(%arg0: i32) -> (i32, i32) {
    %c0_i32 = arith.constant 0 : i32
    %c0_i32_0 = arith.constant 0 : i32
    %c0_i32_1 = arith.constant 0 : i32
    return %c0_i32, %c0_i32_0 : i32, i32
  }
  func.func @transform_3(%arg0: i32) -> (i32, i32) {
    %c0_i32 = arith.constant 0 : i32
    %c0_i32_0 = arith.constant 0 : i32
    %c0_i32_1 = arith.constant 0 : i32
    return %c0_i32, %c0_i32_0 : i32, i32
  }
  func.func @transform_4(%arg0: i32) -> (i32, i32) {
    %c0_i32 = arith.constant 0 : i32
    %c0_i32_0 = arith.constant 0 : i32
    %c0_i32_1 = arith.constant 0 : i32
    return %c0_i32, %c0_i32_0 : i32, i32
  }
  func.func @transform_5(%arg0: i32) -> (i32, i32) {
    %c0_i32 = arith.constant 0 : i32
    %c0_i32_0 = arith.constant 0 : i32
    return %arg0, %c0_i32 : i32, i32
  }
}

</mosaic_0001>

<bundles_post_ra>
// kernel: tpu_custom_call.1
= control target key start
LH: loop header
LB: loop body
LE: loop exit
PB: predicated region body
PF: predicated region fallthrough
CT: control target
= control target key end

     0   :  { %10 = vsyncpa [#allocation3], 0  ;;  %s2443_s0 = inlined_call_operand.hbm [shape: f32[128,256], index: 0, kind: input, shape index: {}]   ;;  %s2444_s1 = inlined_call_operand.hbm [shape: f32[256,128], index: 1, kind: input, shape index: {}]   ;;  %s2445_s2 = inlined_call_operand.vmem [shape: f32[1,128], index: 2, kind: input, shape index: {}]   ;;  %s2446_s3 = inlined_call_operand.vmem [shape: f32[1,128], index: 3, kind: input, shape index: {}]   ;;  %s2447_s4 = inlined_call_operand.vmem [shape: f32[1,128], index: 4, kind: input, shape index: {}]   ;;  %s2448_s5 = inlined_call_operand.hbm [shape: f32[128,128], index: 5, kind: output, shape index: {}]  }
   0x1   :  { %11 = vsyncpa [#allocation6], 0 }
   0x2   :  { %12 = vsyncpa [#allocation4], 0  ;;  %s17_s20 = sshll.u32 %s2443_s0, 4  ;;  %s1572_s21 = smov [#allocation2]   ;;  %s18_s20 = int_to_ptr.hbm [resolvable:$true] %s17_s20 }
   0x3   :  { %s19_s22 = sshll.u32 %s1572_s21, 4  ;;  %s30_s25 = sshll.u32 %s2444_s1, 4  ;;  %s20_s22 = int_to_ptr.vmem [resolvable:$true] %s19_s22  ;;  %s31_s25 = int_to_ptr.hbm [resolvable:$true] %s30_s25 }
   0x4   :  { %s1573_s26 = smov 256   ;;  %s1574_s27 = smov 16  }
   0x5   :  { %25 = dma.hbm_to_vmem [thread:$0]  %s18_s20, 4096, %s20_s22, [#allocation3], %s1573_s26, %s1573_s26, %s1574_s27  }
   0x6   :  { %s1575_s28 = smov [#allocation5]   ;;  %s1576_s30 = smov 128  }
   0x7   :  { %s32_s29 = sshll.u32 %s1575_s28, 4  ;;  %s1577_s6 = smov 8   ;;  %s33_s29 = int_to_ptr.vmem [resolvable:$true] %s32_s29 }
   0x8   :  { %38 = dma.hbm_to_vmem [thread:$0]  %s31_s25, 4096, %s33_s29, [#allocation6], %s1576_s30, %s1576_s30, %s1577_s6  }
   0x9   :  { %1566 = dma.done.wait [#allocation3], 4096  }
   0xa   :  { %1567 = vsyncadd [#allocation3], 4294963200 }
   0xb   :  { %1568 = dma.done.wait [#allocation6], 4096  }
   0xc   :  { %1569 = vsyncadd [#allocation6], 4294963200  ;;  %v100_v0 = vld [vmem:[#allocation5 + $0x78] sm:$0xff]  ;;  %v99_v1 = vld [vmem:[#allocation5 + $0x70] sm:$0xff]  ;;  %s1358_s12 = sshll.u32 %s2448_s5, 4  ;;  %s1359_s12 = int_to_ptr.hbm [resolvable:$true] %s1358_s12 }
   0xd   :  { %v116_v2 = vld [vmem:[#allocation5 + $0xf8] sm:$0xff]  ;;  %121 = vmatpush.msra.mxu0 %v100_v0  ;;  %1388 = vmatpush.msra.mxu2 %v100_v0  ;;  %v115_v3 = vld [vmem:[#allocation5 + $0xf0] sm:$0xff]  ;;  %v98_v4 = vld [vmem:[#allocation5 + $0x68] sm:$0xff] }
   0xe   :  { %186 = vmatpush.msra.mxu1 %v116_v2  ;;  %1404 = vmatpush.msra.mxu3 %v116_v2  ;;  %v114_v5 = vld [vmem:[#allocation5 + $0xe8] sm:$0xff]  ;;  %v97_v6 = vld [vmem:[#allocation5 + $0x60] sm:$0xff]  ;;  %v96_v8 = vld [vmem:[#allocation5 + $0x58] sm:$0xff] }
   0xf   :  { %122 = vmatpush.msra.mxu0 %v99_v1  ;;  %1389 = vmatpush.msra.mxu2 %v99_v1  ;;  %v113_v7 = vld [vmem:[#allocation5 + $0xe0] sm:$0xff]  ;;  %v112_v9 = vld [vmem:[#allocation5 + $0xd8] sm:$0xff]  ;;  %v95_v10 = vld [vmem:[#allocation5 + $0x50] sm:$0xff] }
  0x10   :  { %187 = vmatpush.msra.mxu1 %v115_v3  ;;  %1405 = vmatpush.msra.mxu3 %v115_v3  ;;  %v111_v11 = vld [vmem:[#allocation5 + $0xd0] sm:$0xff]  ;;  %v94_v12 = vld [vmem:[#allocation5 + $0x48] sm:$0xff]  ;;  %v93_v14 = vld [vmem:[#allocation5 + $0x40] sm:$0xff] }
  0x11   :  { %123 = vmatpush.msra.mxu0 %v98_v4  ;;  %1390 = vmatpush.msra.mxu2 %v98_v4  ;;  %v110_v13 = vld [vmem:[#allocation5 + $0xc8] sm:$0xff]  ;;  %v109_v15 = vld [vmem:[#allocation5 + $0xc0] sm:$0xff]  ;;  %v92_v16 = vld [vmem:[#allocation5 + $0x38] sm:$0xff] }
  0x12   :  { %188 = vmatpush.msra.mxu1 %v114_v5  ;;  %1406 = vmatpush.msra.mxu3 %v114_v5  ;;  %v108_v17 = vld [vmem:[#allocation5 + $0xb8] sm:$0xff]  ;;  %v91_v18 = vld [vmem:[#allocation5 + $0x30] sm:$0xff]  ;;  %v90_v20 = vld [vmem:[#allocation5 + $0x28] sm:$0xff] }
  0x13   :  { %124 = vmatpush.msra.mxu0 %v97_v6  ;;  %1391 = vmatpush.msra.mxu2 %v97_v6  ;;  %v107_v19 = vld [vmem:[#allocation5 + $0xb0] sm:$0xff]  ;;  %v106_v21 = vld [vmem:[#allocation5 + $0xa8] sm:$0xff]  ;;  %v89_v22 = vld [vmem:[#allocation5 + $0x20] sm:$0xff] }
  0x14   :  { %189 = vmatpush.msra.mxu1 %v113_v7  ;;  %1407 = vmatpush.msra.mxu3 %v113_v7  ;;  %v105_v23 = vld [vmem:[#allocation5 + $0xa0] sm:$0xff]  ;;  %v88_v24 = vld [vmem:[#allocation5 + $0x18] sm:$0xff]  ;;  %v87_v26 = vld [vmem:[#allocation5 + $0x10] sm:$0xff] }
  0x15   :  { %125 = vmatpush.msra.mxu0 %v96_v8  ;;  %1392 = vmatpush.msra.mxu2 %v96_v8  ;;  %v104_v25 = vld [vmem:[#allocation5 + $0x98] sm:$0xff]  ;;  %v103_v27 = vld [vmem:[#allocation5 + $0x90] sm:$0xff]  ;;  %v86_v28 = vld [vmem:[#allocation5 + $0x8] sm:$0xff] }
  0x16   :  { %190 = vmatpush.msra.mxu1 %v112_v9  ;;  %1408 = vmatpush.msra.mxu3 %v112_v9  ;;  %v102_v29 = vld [vmem:[#allocation5 + $0x88] sm:$0xff]  ;;  %v85_v30 = vld [vmem:[#allocation5] sm:$0xff]  ;;  %v55_v36 = vld [vmem:[#allocation2 + $0x10] sm:$0xff] }
  0x17   :  { %126 = vmatpush.msra.mxu0 %v95_v10  ;;  %1393 = vmatpush.msra.mxu2 %v95_v10  ;;  %v53_v31 = vld [vmem:[#allocation2] sm:$0xff]  ;;  %v54_v34 = vld [vmem:[#allocation2 + $0x8] sm:$0xff]  ;;  %v71_v37 = vld [vmem:[#allocation2 + $0x90] sm:$0xff] }
  0x18   :  { %191 = vmatpush.msra.mxu1 %v111_v11  ;;  %1409 = vmatpush.msra.mxu3 %v111_v11  ;;  %v69_v32 = vld [vmem:[#allocation2 + $0x80] sm:$0xff]  ;;  %v70_v35 = vld [vmem:[#allocation2 + $0x88] sm:$0xff]  ;;  %v56_v38 = vld [vmem:[#allocation2 + $0x18] sm:$0xff] }
  0x19   :  { %127 = vmatpush.msra.mxu0 %v94_v12  ;;  %1394 = vmatpush.msra.mxu2 %v94_v12  ;;  %v101_v33 = vld [vmem:[#allocation5 + $0x80] sm:$0xff]  ;;  %v72_v39 = vld [vmem:[#allocation2 + $0x98] sm:$0xff]  ;;  %v58_v42 = vld [vmem:[#allocation2 + $0x28] sm:$0xff] }
  0x1a   :  { %192 = vmatpush.msra.mxu1 %v110_v13  ;;  %1410 = vmatpush.msra.mxu3 %v110_v13  ;;  %v57_v40 = vld [vmem:[#allocation2 + $0x20] sm:$0xff]  ;;  %v74_v43 = vld [vmem:[#allocation2 + $0xa8] sm:$0xff]  ;;  %v59_v44 = vld [vmem:[#allocation2 + $0x30] sm:$0xff] }
  0x1b   :  { %128 = vmatpush.msra.mxu0 %v93_v14  ;;  %1395 = vmatpush.msra.mxu2 %v93_v14  ;;  %v73_v41 = vld [vmem:[#allocation2 + $0xa0] sm:$0xff]  ;;  %v75_v45 = vld [vmem:[#allocation2 + $0xb0] sm:$0xff]  ;;  %v60_v46 = vld [vmem:[#allocation2 + $0x38] sm:$0xff] }
  0x1c   :  { %193 = vmatpush.msra.mxu1 %v109_v15  ;;  %1411 = vmatpush.msra.mxu3 %v109_v15  ;;  %v76_v47 = vld [vmem:[#allocation2 + $0xb8] sm:$0xff]  ;;  %v61_v48 = vld [vmem:[#allocation2 + $0x40] sm:$0xff]  ;;  %v62_v50 = vld [vmem:[#allocation2 + $0x48] sm:$0xff] }
  0x1d   :  { %129 = vmatpush.msra.mxu0 %v92_v16  ;;  %1396 = vmatpush.msra.mxu2 %v92_v16  ;;  %v77_v49 = vld [vmem:[#allocation2 + $0xc0] sm:$0xff]  ;;  %v78_v51 = vld [vmem:[#allocation2 + $0xc8] sm:$0xff]  ;;  %v63_v52 = vld [vmem:[#allocation2 + $0x50] sm:$0xff] }
  0x1e   :  { %194 = vmatpush.msra.mxu1 %v108_v17  ;;  %1412 = vmatpush.msra.mxu3 %v108_v17  ;;  %v79_v53 = vld [vmem:[#allocation2 + $0xd0] sm:$0xff]  ;;  %v64_v54 = vld [vmem:[#allocation2 + $0x58] sm:$0xff]  ;;  %v65_v56 = vld [vmem:[#allocation2 + $0x60] sm:$0xff] }
  0x1f   :  { %130 = vmatpush.msra.mxu0 %v91_v18  ;;  %1397 = vmatpush.msra.mxu2 %v91_v18  ;;  %v80_v55 = vld [vmem:[#allocation2 + $0xd8] sm:$0xff]  ;;  %v81_v57 = vld [vmem:[#allocation2 + $0xe0] sm:$0xff]  ;;  %v66_v58 = vld [vmem:[#allocation2 + $0x68] sm:$0xff] }
  0x20   :  { %195 = vmatpush.msra.mxu1 %v107_v19  ;;  %1413 = vmatpush.msra.mxu3 %v107_v19  ;;  %v82_v59 = vld [vmem:[#allocation2 + $0xe8] sm:$0xff]  ;;  %v67_v60 = vld [vmem:[#allocation2 + $0x70] sm:$0xff]  ;;  %v68_v62 = vld [vmem:[#allocation2 + $0x78] sm:$0xff] }
  0x21   :  { %131 = vmatpush.msra.mxu0 %v90_v20  ;;  %1398 = vmatpush.msra.mxu2 %v90_v20  ;;  %v83_v61 = vld [vmem:[#allocation2 + $0xf0] sm:$0xff]  ;;  %v84_v63 = vld [vmem:[#allocation2 + $0xf8] sm:$0xff]  ;;  %v1621_v0 = vld [vmem:[%s2445_s2] ss:$0 sm:$0xff] }
  0x22   :  { %196 = vmatpush.msra.mxu1 %v106_v21  ;;  %1414 = vmatpush.msra.mxu3 %v106_v21 }
  0x23   :  { %132 = vmatpush.msra.mxu0 %v89_v22  ;;  %1399 = vmatpush.msra.mxu2 %v89_v22 }
  0x24   :  { %197 = vmatpush.msra.mxu1 %v105_v23  ;;  %1415 = vmatpush.msra.mxu3 %v105_v23 }
  0x25   :  { %133 = vmatpush.msra.mxu0 %v88_v24  ;;  %1400 = vmatpush.msra.mxu2 %v88_v24 }
  0x26   :  { %198 = vmatpush.msra.mxu1 %v104_v25  ;;  %1416 = vmatpush.msra.mxu3 %v104_v25 }
  0x27   :  { %134 = vmatpush.msra.mxu0 %v87_v26  ;;  %1401 = vmatpush.msra.mxu2 %v87_v26 }
  0x28   :  { %199 = vmatpush.msra.mxu1 %v103_v27  ;;  %1417 = vmatpush.msra.mxu3 %v103_v27 }
  0x29   :  { %135 = vmatpush.msra.mxu0 %v86_v28  ;;  %1402 = vmatpush.msra.mxu2 %v86_v28 }
  0x2a   :  { %200 = vmatpush.msra.mxu1 %v102_v29  ;;  %1418 = vmatpush.msra.mxu3 %v102_v29 }
  0x2b   :  { %136 = vmatpush.msra.mxu0 %v85_v30  ;;  %1403 = vmatpush.msra.mxu2 %v85_v30 }
  0x2c   :  { %137 = vmatmul.f32.vlgmr.msra.gmra.mxu0 %v53_v31  ;;  %161 = vmatmul.f32.vlgmr.msra.gmra.mxu2 %v69_v32 }
  0x2d   :  { %201 = vmatpush.msra.mxu1 %v101_v33  ;;  %1419 = vmatpush.msra.mxu3 %v101_v33 }
  0x2e   :  { %202 = vmatmul.f32.vlgmr.msra.gmra.mxu1 %v54_v34  ;;  %226 = vmatmul.f32.vlgmr.msra.gmra.mxu3 %v70_v35 }
  0x34   :  { %140 = vmatmul.f32.gmra.mxu0 %v55_v36  ;;  %164 = vmatmul.f32.gmra.mxu2 %v71_v37 }
  0x36   :  { %205 = vmatmul.f32.gmra.mxu1 %v56_v38  ;;  %229 = vmatmul.f32.gmra.mxu3 %v72_v39 }
  0x3c   :  { %143 = vmatmul.f32.gmra.mxu0 %v57_v40  ;;  %167 = vmatmul.f32.gmra.mxu2 %v73_v41 }
  0x3e   :  { %208 = vmatmul.f32.gmra.mxu1 %v58_v42  ;;  %232 = vmatmul.f32.gmra.mxu3 %v74_v43 }
  0x44   :  { %146 = vmatmul.f32.gmra.mxu0 %v59_v44  ;;  %170 = vmatmul.f32.gmra.mxu2 %v75_v45 }
  0x46   :  { %211 = vmatmul.f32.gmra.mxu1 %v60_v46  ;;  %235 = vmatmul.f32.gmra.mxu3 %v76_v47 }
  0x4c   :  { %149 = vmatmul.f32.gmra.mxu0 %v61_v48  ;;  %173 = vmatmul.f32.gmra.mxu2 %v77_v49 }
  0x4e   :  { %214 = vmatmul.f32.gmra.mxu1 %v62_v50  ;;  %238 = vmatmul.f32.gmra.mxu3 %v78_v51 }
  0x54   :  { %152 = vmatmul.f32.gmra.mxu0 %v63_v52  ;;  %176 = vmatmul.f32.gmra.mxu2 %v79_v53 }
  0x56   :  { %217 = vmatmul.f32.gmra.mxu1 %v64_v54  ;;  %241 = vmatmul.f32.gmra.mxu3 %v80_v55 }
  0x5c   :  { %155 = vmatmul.f32.gmra.mxu0 %v65_v56  ;;  %179 = vmatmul.f32.gmra.mxu2 %v81_v57 }
  0x5e   :  { %220 = vmatmul.f32.gmra.mxu1 %v66_v58  ;;  %244 = vmatmul.f32.gmra.mxu3 %v82_v59 }
  0x64   :  { %158 = vmatmul.f32.gmra.mxu0 %v67_v60  ;;  %182 = vmatmul.f32.gmra.mxu2 %v83_v61 }
  0x66   :  { %223 = vmatmul.f32.gmra.mxu1 %v68_v62  ;;  %247 = vmatmul.f32.gmra.mxu3 %v84_v63 }
  0xa9   :  { %v138_v1 = vpop.f32.mrf.mxu0 }
  0xaa   :  { %v139_v2 = vadd.f32 %v1621_v0, %v138_v1 }
  0xab   :  { %v203_v3 = vpop.f32.mrf.mxu1 }
  0xac   :  { %v1624_v4 = vadd.f32 %v203_v3, %v139_v2 }
  0xae   :  { %v1627_v5 = vmul.f32 0.70710677, %v1624_v4 }
  0xaf   :  { %v162_v6 = vpop.f32.mrf.mxu2 }
  0xb0   :  { %v283_v7 = vmul.f32 %v1627_v5, %v1627_v5  ;;  %v163_v8 = vadd.f32 %v1621_v0, %v162_v6 }
  0xb1   :  { %v141_v9 = vpop.f32.mrf.mxu0  ;;  %v227_v10 = vpop.f32.mrf.mxu3 }
  0xb2   :  { %v142_v11 = vadd.f32 %v1621_v0, %v141_v9  ;;  %v1633_v12 = vadd.f32 %v227_v10, %v163_v8  ;;  %v1635_v14 = vmin.f32 %v283_v7, 16.0 }
  0xb3   :  { %v206_v13 = vpop.f32.mrf.mxu1 }
  0xb4   :  { %v1638_v15 = vmul.f32 0.70710677, %v1633_v12  ;;  %v1640_v16 = vadd.f32 %v206_v13, %v142_v11  ;;  %v285_v20 = vmul.f32 2.1237322e-06, %v1635_v14  ;;  %v296_v38 = vmul.f32 3.8918573e-05, %v1635_v14 }
  0xb6   :  { %v603_v17 = vmul.f32 %v1638_v15, %v1638_v15  ;;  %v1645_v18 = vmul.f32 0.70710677, %v1640_v16  ;;  %v286_v30 = vadd.f32 0.00028619796, %v285_v20  ;;  %v297_v51 = vadd.f32 0.001143296, %v296_v38 }
  0xb7   :  { %v165_v19 = vpop.f32.mrf.mxu2 }
  0xb8   :  { %v1648_v21 = vmin.f32 %v603_v17, 16.0  ;;  %v323_v22 = vmul.f32 %v1645_v18, %v1645_v18  ;;  %v166_v23 = vadd.f32 %v1621_v0, %v165_v19  ;;  %v287_v39 = vmul.f32 %v286_v30, %v1635_v14 }
  0xb9   :  { %v144_v24 = vpop.f32.mrf.mxu0  ;;  %v230_v25 = vpop.f32.mrf.mxu3  ;;  %v298_v61 = vmul.f32 %v297_v51, %v1635_v14 }
  0xba   :  { %v1653_v26 = vmin.f32 %v323_v22, 16.0  ;;  %v145_v27 = vadd.f32 %v1621_v0, %v144_v24  ;;  %v1656_v28 = vadd.f32 %v230_v25, %v166_v23  ;;  %v605_v31 = vmul.f32 2.1237322e-06, %v1648_v21 }
  0xbb   :  { %v209_v29 = vpop.f32.mrf.mxu1  ;;  %v288_v52 = vadd.f32 0.0036580483, %v287_v39  ;;  %v299_v20 = vadd.f32 0.014752088, %v298_v61 }
  0xbc   :  { %v1659_v32 = vadd.f32 %v209_v29, %v145_v27  ;;  %v325_v33 = vmul.f32 2.1237322e-06, %v1653_v26  ;;  %v1663_v34 = vmul.f32 0.70710677, %v1656_v28  ;;  %v606_v40 = vadd.f32 0.00028619796, %v605_v31 }
  0xbd   :  { %v289_v62 = vmul.f32 %v288_v52, %v1635_v14 }
  0xbe   :  { %v643_v35 = vmul.f32 %v1663_v34, %v1663_v34  ;;  %v1668_v36 = vmul.f32 0.70710677, %v1659_v32  ;;  %v326_v42 = vadd.f32 0.00028619796, %v325_v33  ;;  %v607_v53 = vmul.f32 %v606_v40, %v1648_v21 }
  0xbf   :  { %v168_v37 = vpop.f32.mrf.mxu2  ;;  %v290_v22 = vadd.f32 0.05243302, %v289_v62  ;;  %v300_v40 = vmul.f32 %v299_v20, %v1635_v14 }
  0xc0   :  { %v169_v41 = vadd.f32 %v1621_v0, %v168_v37  ;;  %v1673_v43 = vmin.f32 %v643_v35, 16.0  ;;  %v363_v44 = vmul.f32 %v1668_v36, %v1668_v36  ;;  %v327_v55 = vmul.f32 %v326_v42, %v1653_v26 }
  0xc1   :  { %v147_v45 = vpop.f32.mrf.mxu0  ;;  %v233_v46 = vpop.f32.mrf.mxu3  ;;  %v608_v63 = vadd.f32 0.0036580483, %v607_v53  ;;  %v1719_v35 = vmul.f32 0.5, %v1624_v4  ;;  %v1722_v37 = vmul.f32 0.5, %v1633_v12  ;;  %v301_v62 = vadd.f32 0.112945676, %v300_v40 }
  0xc2   :  { %v148_v47 = vadd.f32 %v1621_v0, %v147_v45  ;;  %v1678_v48 = vmin.f32 %v363_v44, 16.0  ;;  %v1680_v49 = vadd.f32 %v233_v46, %v169_v41  ;;  %v645_v56 = vmul.f32 2.1237322e-06, %v1673_v43 }
  0xc3   :  { %v212_v50 = vpop.f32.mrf.mxu1  ;;  %v328_v2 = vadd.f32 0.0036580483, %v327_v55  ;;  %v609_v27 = vmul.f32 %v608_v63, %v1648_v21  ;;  %v291_v41 = vmul.f32 %v290_v22, %v1635_v14  ;;  %v616_v63 = vmul.f32 3.8918573e-05, %v1648_v21 }
  0xc4   :  { %v1683_v54 = vadd.f32 %v212_v50, %v148_v47  ;;  %v365_v57 = vmul.f32 2.1237322e-06, %v1678_v48  ;;  %v1689_v58 = vmul.f32 0.70710677, %v1680_v49  ;;  %v646_v3 = vadd.f32 0.00028619796, %v645_v56 }
  0xc5   :  { %v329_v29 = vmul.f32 %v328_v2, %v1653_v26  ;;  %v610_v46 = vadd.f32 0.05243302, %v609_v27  ;;  %v1758_v22 = vmul.f32 0.5, %v1659_v32 }
  0xc6   :  { %v1692_v59 = vmul.f32 0.70710677, %v1683_v54  ;;  %v683_v1 = vmul.f32 %v1689_v58, %v1689_v58  ;;  %v366_v10 = vadd.f32 0.00028619796, %v365_v57  ;;  %v647_v30 = vmul.f32 %v646_v3, %v1673_v43 }
  0xc7   :  { %v171_v60 = vpop.f32.mrf.mxu2  ;;  %v330_v4 = vadd.f32 0.05243302, %v329_v29  ;;  %v302_v29 = vmul.f32 %v301_v62, %v1635_v14 }
  0xc8   :  { %v403_v6 = vmul.f32 %v1692_v59, %v1692_v59  ;;  %v172_v7 = vadd.f32 %v1621_v0, %v171_v60  ;;  %v1701_v11 = vmin.f32 %v683_v1, 16.0  ;;  %v367_v31 = vmul.f32 %v366_v10, %v1678_v48 }
  0xc9   :  { %v150_v8 = vpop.f32.mrf.mxu0  ;;  %v236_v9 = vpop.f32.mrf.mxu3  ;;  %v648_v47 = vadd.f32 0.0036580483, %v647_v30  ;;  %v292_v1 = vadd.f32 0.18741608, %v291_v41  ;;  %v1751_v10 = vmul.f32 0.5, %v1656_v28 }
  0xca   :  { %v151_v13 = vadd.f32 %v1621_v0, %v150_v8  ;;  %v1704_v17 = vadd.f32 %v236_v9, %v172_v7  ;;  %v685_v23 = vmul.f32 2.1237322e-06, %v1701_v11  ;;  %v1707_v24 = vmin.f32 %v403_v6, 16.0 }
  0xcb   :  { %v215_v19 = vpop.f32.mrf.mxu1  ;;  %v368_v52 = vadd.f32 0.0036580483, %v367_v31  ;;  %v611_v6 = vmul.f32 %v610_v46, %v1648_v21  ;;  %v1745_v7 = vmul.f32 0.5, %v1640_v16  ;;  %v331_v8 = vmul.f32 %v330_v4, %v1653_v26 }
  0xcc   :  { %v1709_v25 = vadd.f32 %v215_v19, %v151_v13  ;;  %v1716_v33 = vmul.f32 0.70710677, %v1704_v17  ;;  %v686_v38 = vadd.f32 0.00028619796, %v685_v23  ;;  %v405_v42 = vmul.f32 2.1237322e-06, %v1707_v24 }
  0xcd   :  { %v649_v13 = vmul.f32 %v648_v47, %v1673_v43  ;;  %v369_v19 = vmul.f32 %v368_v52, %v1678_v48  ;;  %v293_v30 = vmul.f32 %v292_v1, %v1635_v14  ;;  %v332_v40 = vadd.f32 0.18741608, %v331_v8 }
  0xce   :  { %v723_v44 = vmul.f32 %v1716_v33, %v1716_v33  ;;  %v1730_v45 = vmul.f32 0.70710677, %v1709_v25  ;;  %v687_v57 = vmul.f32 %v686_v38, %v1701_v11  ;;  %v406_v2 = vadd.f32 0.00028619796, %v405_v42 }
  0xcf   :  { %v174_v39 = vpop.f32.mrf.mxu2  ;;  %v1766_v38 = vadd.f32 0.001143296, %v616_v63  ;;  %v650_v46 = vadd.f32 0.05243302, %v649_v13  ;;  %v370_v4 = vadd.f32 0.05243302, %v369_v19  ;;  %v333_v13 = vmul.f32 %v332_v40, %v1653_v26 }
  0xd0   :  { %v175_v12 = vadd.f32 %v1621_v0, %v174_v39  ;;  %v1733_v53 = vmin.f32 %v723_v44, 16.0  ;;  %v443_v55 = vmul.f32 %v1730_v45, %v1730_v45  ;;  %v688_v23 = vadd.f32 0.0036580483, %v687_v57 }
  0xd1   :  { %v153_v50 = vpop.f32.mrf.mxu0  ;;  %v239_v51 = vpop.f32.mrf.mxu3  ;;  %v407_v28 = vmul.f32 %v406_v2, %v1707_v24  ;;  %v612_v39 = vadd.f32 0.18741608, %v611_v6  ;;  %v303_v63 = vadd.f32 0.4994258, %v302_v29  ;;  %v1786_v2 = vmul.f32 0.5, %v1680_v49 }
  0xd2   :  { %v154_v56 = vadd.f32 %v1621_v0, %v153_v50  ;;  %v1739_v60 = vadd.f32 %v239_v51, %v175_v12  ;;  %v725_v3 = vmul.f32 2.1237322e-06, %v1733_v53  ;;  %v1755_v20 = vmin.f32 %v443_v55, 16.0 }
  0xd3   :  { %v218_v61 = vpop.f32.mrf.mxu1  ;;  %v689_v50 = vmul.f32 %v688_v23, %v1701_v11  ;;  %v408_v57 = vadd.f32 0.0036580483, %v407_v28  ;;  %v613_v1 = vmul.f32 %v612_v39, %v1648_v21  ;;  %v294_v8 = vadd.f32 1.1283791, %v293_v30 }
  0xd4   :  { %v1748_v9 = vadd.f32 %v218_v61, %v154_v56  ;;  %v1761_v16 = vmul.f32 0.70710677, %v1739_v60  ;;  %v726_v31 = vadd.f32 0.00028619796, %v725_v3  ;;  %v445_v47 = vmul.f32 2.1237322e-06, %v1755_v20 }
  0xd5   :  { %v371_v28 = vmul.f32 %v370_v4, %v1678_v48  ;;  %v690_v29 = vadd.f32 0.05243302, %v689_v50  ;;  %v1798_v49 = vmul.f32 0.5, %v1683_v54  ;;  %v409_v39 = vmul.f32 %v408_v57, %v1707_v24 }
  0xd6   :  { %v763_v32 = vmul.f32 %v1761_v16, %v1761_v16  ;;  %v1771_v41 = vmul.f32 0.70710677, %v1748_v9  ;;  %v727_v61 = vmul.f32 %v726_v31, %v1733_v53  ;;  %v446_v19 = vadd.f32 0.00028619796, %v445_v47 }
  0xd7   :  { %v177_v27 = vpop.f32.mrf.mxu2  ;;  %2455 = vst [vmem:[#allocation12_spill] sm:$0xff] %v1798_v49  ;;  %v691_v57 = vmul.f32 %v690_v29, %v1701_v11 }
  0xd8   :  { %v178_v12 = vadd.f32 %v1621_v0, %v177_v27  ;;  %v1776_v51 = vmin.f32 %v763_v32, 16.0  ;;  %v483_v52 = vmul.f32 %v1771_v41, %v1771_v41  ;;  %v651_v27 = vmul.f32 %v650_v46, %v1673_v43 }
  0xd9   :  { %v156_v42 = vpop.f32.mrf.mxu0  ;;  %v242_v44 = vpop.f32.mrf.mxu3  ;;  %v728_v32 = vadd.f32 0.0036580483, %v727_v61  ;;  %v304_v46 = vmul.f32 %v303_v63, %v1635_v14  ;;  %v447_v4 = vmul.f32 %v446_v19, %v1755_v20 }
  0xda   :  { %v157_v55 = vadd.f32 %v1621_v0, %v156_v42  ;;  %v1782_v62 = vadd.f32 %v242_v44, %v178_v12  ;;  %v765_v3 = vmul.f32 2.1237322e-06, %v1776_v51  ;;  %v1789_v6 = vmin.f32 %v483_v52, 16.0 }
  0xdb   :  { %v221_v56 = vpop.f32.mrf.mxu1  ;;  %v614_v42 = vadd.f32 1.1283791, %v613_v1  ;;  %v334_v12 = vadd.f32 1.1283791, %v333_v13  ;;  %v410_v1 = vadd.f32 0.05243302, %v409_v39 }
  0xdc   :  { %v1792_v23 = vadd.f32 %v221_v56, %v157_v55  ;;  %v485_v31 = vmul.f32 2.1237322e-06, %v1789_v6  ;;  %v1802_v30 = vmul.f32 0.70710677, %v1782_v62  ;;  %v766_v44 = vadd.f32 0.00028619796, %v765_v3 }
  0xdd   :  { %v652_v55 = vadd.f32 0.18741608, %v651_v27  ;;  %v372_v56 = vadd.f32 0.18741608, %v371_v28  ;;  %v729_v3 = vmul.f32 %v728_v32, %v1733_v53  ;;  %v1822_v27 = vadd.f32 1.0, %v304_v46 }
  0xde   :  { %2454 = vst [vmem:[#allocation11_spill] sm:$0xff] %v1792_v23  ;;  %v486_v47 = vadd.f32 0.00028619796, %v485_v31  ;;  %v803_v50 = vmul.f32 %v1802_v30, %v1802_v30  ;;  %v1809_v54 = vmul.f32 0.70710677, %v1792_v23  ;;  %v767_v13 = vmul.f32 %v766_v44, %v1776_v51 }
  0xdf   :  { %v180_v40 = vpop.f32.mrf.mxu2  ;;  %v1825_v28 = vmul.f32 %v294_v8, %v1627_v5  ;;  %v448_v29 = vadd.f32 0.0036580483, %v447_v4  ;;  %v692_v23 = vadd.f32 0.18741608, %v691_v57  ;;  %v730_v46 = vadd.f32 0.05243302, %v729_v3 }
  0xe0   :  { %v181_v61 = vadd.f32 %v1621_v0, %v180_v40  ;;  %v1814_v14 = vmin.f32 %v803_v50, 16.0  ;;  %v523_v63 = vmul.f32 %v1809_v54, %v1809_v54  ;;  %v487_v19 = vmul.f32 %v486_v47, %v1789_v6 }
  0xe1   :  { %v245_v52 = vpop.f32.mrf.mxu3  ;;  %v653_v40 = vmul.f32 %v652_v55, %v1673_v43  ;;  %v373_v50 = vmul.f32 %v372_v56, %v1678_v48  ;;  %v411_v47 = vmul.f32 %v410_v1, %v1707_v24  ;;  %v768_v8 = vadd.f32 0.0036580483, %v767_v13 }
  0xe2   :  { %v1820_v31 = vadd.f32 %v245_v52, %v181_v61  ;;  %v805_v39 = vmul.f32 2.1237322e-06, %v1814_v14  ;;  %v1828_v32 = vmin.f32 %v523_v63, 16.0  ;;  %v488_v4 = vadd.f32 0.0036580483, %v487_v19  ;;  %v159_v61 = vpop.f32.mrf.mxu0 }
  0xe3   :  { %1430 = vrcp.f32 %v1822_v27  ;;  %v1841_v55 = vmul.f32 %v614_v42, %v1638_v15  ;;  %v1844_v56 = vmul.f32 0.5, %v1704_v17  ;;  %v449_v57 = vmul.f32 %v448_v29, %v1755_v20 }
  0xe4   :  { %2456 = vst [vmem:[#allocation13_spill] sm:$0xff] %v1820_v31  ;;  %v1833_v44 = vmul.f32 0.70710677, %v1820_v31  ;;  %v806_v52 = vadd.f32 0.00028619796, %v805_v39  ;;  %v1848_v39 = vmul.f32 0.5, %v1709_v25  ;;  %v1854_v31 = vmul.f32 %v334_v12, %v1645_v18 }
  0xe5   :  { %v525_v5 = vmul.f32 2.1237322e-06, %v1828_v32  ;;  %v654_v3 = vadd.f32 1.1283791, %v653_v40  ;;  %v693_v15 = vmul.f32 %v692_v23, %v1701_v11  ;;  %v160_v17 = vadd.f32 %v1621_v0, %v159_v61 }
  0xe6   :  { %2457 = vst [vmem:[#allocation14_spill] sm:$0xff] %v1833_v44  ;;  %v843_v63 = vmul.f32 %v1833_v44, %v1833_v44  ;;  %v807_v13 = vmul.f32 %v806_v52, %v1814_v14  ;;  %v374_v44 = vadd.f32 1.1283791, %v373_v50  ;;  %v412_v42 = vadd.f32 0.18741608, %v411_v47 }
  0xe7   :  { %v526_v1 = vadd.f32 0.00028619796, %v525_v5  ;;  %2458 = vst [vmem:[#allocation15_spill] sm:$0xff] %v1848_v39  ;;  %v731_v29 = vmul.f32 %v730_v46, %v1733_v53  ;;  %v769_v40 = vmul.f32 %v768_v8, %v1776_v51  ;;  %v489_v25 = vmul.f32 %v488_v4, %v1789_v6  ;;  %v224_v5 = vpop.f32.mrf.mxu1 }
  0xe8   :  { %v1851_v19 = vmin.f32 %v843_v63, 16.0  ;;  %v450_v39 = vadd.f32 0.05243302, %v449_v57  ;;  %v1862_v52 = vmul.f32 0.5, %v1739_v60  ;;  %v618_v12 = vmul.f32 %v1766_v38, %v1648_v21 }
  0xe9   :  { %v527_v18 = vmul.f32 %v526_v1, %v1828_v32  ;;  %v1431_v23 = vpop.eup %1430  ;;  %v1868_v50 = vmul.f32 %v654_v3, %v1663_v34  ;;  %v1871_v47 = vmul.f32 0.5, %v1748_v9  ;;  %v808_v46 = vadd.f32 0.0036580483, %v807_v13 }
  0xea   :  { %2459 = vst [vmem:[#allocation16_spill] sm:$0xff] %v1862_v52  ;;  %v845_v8 = vmul.f32 2.1237322e-06, %v1851_v19  ;;  %v1875_v4 = vmul.f32 %v374_v44, %v1668_v36  ;;  %v1877_v60 = vadd.f32 1.1283791, %v693_v15  ;;  %v307_v61 = vmul.f32 %v1431_v23, %v1822_v27 }
  0xeb   :  { %2460 = vst [vmem:[#allocation17_spill] sm:$0xff] %v1871_v47  ;;  %v1880_v63 = vadd.f32 %v224_v5, %v160_v17  ;;  %v1883_v38 = vmul.f32 %v412_v42, %v1707_v24  ;;  %v732_v34 = vadd.f32 0.18741608, %v731_v29  ;;  %v770_v57 = vadd.f32 0.05243302, %v769_v40 }
  0xec   :  { %v490_v1 = vadd.f32 0.05243302, %v489_v25  ;;  %v451_v9 = vmul.f32 %v450_v39, %v1755_v20  ;;  %v528_v3 = vadd.f32 0.0036580483, %v527_v18  ;;  %v308_v13 = vsub.f32 1.0, %v307_v61 }
  0xed   :  { %2461 = vst [vmem:[#allocation18_spill] sm:$0xff] %v1880_v63  ;;  %v315_v47 = vand.u32 2147483647, %v1822_v27  ;;  %v809_v36 = vmul.f32 %v808_v46, %v1814_v14  ;;  %v846_v44 = vadd.f32 0.00028619796, %v845_v8  ;;  %v317_v15 = vand.u32 2147483648, %v1822_v27 }
  0xee   :  { %v619_v52 = vadd.f32 0.014752088, %v618_v12  ;;  %v309_v17 = vmul.f32 %v1431_v23, %v308_v13  ;;  %vm312_vm0 = vweird.f32 %v1431_v23  ;;  %v1890_v42 = vmul.f32 0.70710677, %v1880_v63 }
  0xef   :  { %v336_v29 = vmul.f32 3.8918573e-05, %v1653_v26  ;;  %v771_v40 = vmul.f32 %v770_v57, %v1776_v51  ;;  %v491_v39 = vmul.f32 %v490_v1, %v1789_v6  ;;  %vm311_vm1 = vweird.f32 %v1822_v27 }
  0xf0   :  { %2462 = vst [vmem:[#allocation19_spill] sm:$0xff] %v1890_v42  ;;  %v620_v25 = vmul.f32 %v619_v52, %v1648_v21  ;;  %v529_v5 = vmul.f32 %v528_v3, %v1828_v32  ;;  %v310_v18 = vadd.f32 %v1431_v23, %v309_v17  ;;  %vm316_vm2 = vcmp.eq.f32.partialorder %v315_v47, 8.507059e+37  ;;  %vm313_vm3 = vmor %vm311_vm1, %vm312_vm0 }
  0xf1   :  { %v337_v12 = vadd.f32 0.001143296, %v336_v29  ;;  %v810_v46 = vadd.f32 0.05243302, %v809_v36  ;;  %v847_v8 = vmul.f32 %v846_v44, %v1851_v19  ;;  %v318_v61 = vor.u32 1.1754944e-38, %v317_v15 }
  0xf2   :  { %v621_v13 = vadd.f32 0.112945676, %v620_v25  ;;  %v314_v63 = vsel %vm313_vm3, %v1431_v23, %v310_v18  ;;  %v563_v57 = vmul.f32 %v1890_v42, %v1890_v42  ;;  %v376_v27 = vmul.f32 3.8918573e-05, %v1678_v48 }
  0xf3   :  { %v338_v1 = vmul.f32 %v337_v12, %v1653_v26  ;;  %v452_v52 = vadd.f32 0.18741608, %v451_v9  ;;  %v772_v49 = vadd.f32 0.18741608, %v771_v40  ;;  %v319_v3 = vsel %vm316_vm2, %v318_v61, %v314_v63 }
  0xf4   :  { %v622_v47 = vmul.f32 %v621_v13, %v1648_v21  ;;  %v1905_v36 = vmul.f32 0.5, %v1782_v62  ;;  %v530_v44 = vadd.f32 0.05243302, %v529_v5  ;;  %v320_v15 = vmul.f32 %v319_v3, %v1825_v28 }
  0xf5   :  { %v339_v17 = vadd.f32 0.014752088, %v338_v1  ;;  %v492_v23 = vadd.f32 0.18741608, %v491_v39  ;;  %v811_v29 = vmul.f32 %v810_v46, %v1814_v14  ;;  %v848_v25 = vadd.f32 0.0036580483, %v847_v8 }
  0xf6   :  { %v623_v18 = vadd.f32 0.4994258, %v622_v47  ;;  %v1372_v12 = vclamps-f32 %v320_v15, 1.0  ;;  %v1909_v42 = vmin.f32 %v563_v57, 16.0  ;;  %v377_v63 = vadd.f32 0.001143296, %v376_v27 }
  0xf7   :  { %v340_v9 = vmul.f32 %v339_v17, %v1653_v26  ;;  %v733_v40 = vmul.f32 %v732_v34, %v1733_v53  ;;  %v453_v62 = vmul.f32 %v452_v52, %v1755_v20  ;;  %v773_v5 = vmul.f32 %v772_v49, %v1776_v51 }
  0xf8   :  { %v624_v28 = vmul.f32 %v623_v18, %v1648_v21  ;;  %v531_v39 = vmul.f32 %v530_v44, %v1828_v32  ;;  %v923_v61 = vadd.f32 1.0, %v1372_v12  ;;  %v378_v8 = vmul.f32 %v377_v63, %v1678_v48 }
  0xf9   :  { %v341_v46 = vadd.f32 0.112945676, %v340_v9  ;;  %v493_v13 = vmul.f32 %v492_v23, %v1789_v6  ;;  %v812_v57 = vadd.f32 0.18741608, %v811_v29  ;;  %v849_v1 = vmul.f32 %v848_v25, %v1851_v19 }
  0xfa   :  { %v1920_v27 = vadd.f32 1.0, %v624_v28  ;;  %v1923_v34 = vmul.f32 %v923_v61, %v1719_v35  ;;  %v565_v49 = vmul.f32 2.1237322e-06, %v1909_v42  ;;  %v379_v52 = vadd.f32 0.014752088, %v378_v8 }
  0xfb   :  { %v342_v21 = vmul.f32 %v341_v46, %v1653_v26  ;;  %v414_v3 = vadd.f32 1.1283791, %v1883_v38  ;;  %v734_v47 = vadd.f32 1.1283791, %v733_v40  ;;  %v454_v44 = vadd.f32 1.1283791, %v453_v62  ;;  %v183_v46 = vpop.f32.mrf.mxu2 }
  0xfc   :  { %1432 = vrcp.f32 %v1920_v27  ;;  %v1931_v15 = vmul.f32 %v1877_v60, %v1689_v58  ;;  %v774_v17 = vadd.f32 1.1283791, %v773_v5  ;;  %v532_v23 = vadd.f32 0.18741608, %v531_v39  ;;  %955 = vadd.xlane.f32.xlu0 %v1923_v34 }
  0xfd   :  { %v343_v35 = vadd.f32 0.4994258, %v342_v21  ;;  %v813_v29 = vmul.f32 %v812_v57, %v1814_v14  ;;  %v380_v25 = vmul.f32 %v379_v52, %v1678_v48  ;;  %v656_v18 = vmul.f32 3.8918573e-05, %v1673_v43 }
  0xfe   :  { %v696_v38 = vmul.f32 3.8918573e-05, %v1701_v11  ;;  %v494_v12 = vadd.f32 1.1283791, %v493_v13  ;;  %v850_v9 = vadd.f32 0.05243302, %v849_v1  ;;  %v1940_v58 = vmul.f32 %v414_v3, %v1692_v59 }
  0xff   :  { %v566_v63 = vadd.f32 0.00028619796, %v565_v49  ;;  %v344_v40 = vmul.f32 %v343_v35, %v1653_v26  ;;  %v381_v60 = vadd.f32 0.112945676, %v380_v25  ;;  %v657_v62 = vadd.f32 0.001143296, %v656_v18 }
 0x100   :  { %v697_v5 = vadd.f32 0.001143296, %v696_v38  ;;  %v1943_v28 = vmul.f32 %v734_v47, %v1716_v33  ;;  %v1946_v39 = vmul.f32 %v454_v44, %v1730_v45  ;;  %v533_v61 = vmul.f32 %v532_v23, %v1828_v32 }
 0x101   :  { %v1949_v8 = vadd.f32 1.0, %v344_v40  ;;  %v814_v57 = vadd.f32 1.1283791, %v813_v29  ;;  %v382_v26 = vmul.f32 %v381_v60, %v1678_v48  ;;  %v658_v59 = vmul.f32 %v657_v62, %v1673_v43 }
 0x102   :  { %v1433_v13 = vpop.eup %1432  ;;  %v698_v1 = vmul.f32 %v697_v5, %v1701_v11  ;;  %v1955_v49 = vmul.f32 %v774_v17, %v1761_v16  ;;  %v736_v45 = vmul.f32 3.8918573e-05, %v1733_v53  ;;  %v1961_v21 = vmul.f32 %v494_v12, %v1771_v41  ;;  %v248_v17 = vpop.f32.mrf.mxu3 }
 0x103   :  { %v627_v33 = vmul.f32 %v1433_v13, %v1920_v27  ;;  %1434 = vrcp.f32 %v1949_v8  ;;  %v851_v52 = vmul.f32 %v850_v9, %v1851_v19  ;;  %v567_v3 = vmul.f32 %v566_v63, %v1909_v42 }
 0x104   :  { %v184_v47 = vadd.f32 %v1621_v0, %v183_v46  ;;  %v1966_v44 = vadd.f32 1.1283791, %v533_v61  ;;  %v637_v16 = vand.u32 2147483648, %v1920_v27  ;;  %v383_v35 = vadd.f32 0.4994258, %v382_v26 }
 0x105   :  { %v628_v23 = vsub.f32 1.0, %v627_v33  ;;  %v1970_v29 = vmul.f32 %v814_v57, %v1802_v30  ;;  %v635_v25 = vand.u32 2147483647, %v1920_v27  ;;  %v659_v41 = vadd.f32 0.014752088, %v658_v59 }
 0x106   :  { %v699_v18 = vadd.f32 0.014752088, %v698_v1  ;;  %vm632_vm4 = vweird.f32 %v1433_v13  ;;  %v384_v12 = vmul.f32 %v383_v35, %v1678_v48  ;;  %v737_v9 = vadd.f32 0.001143296, %v736_v45 }
 0x107   :  { %v629_v38 = vmul.f32 %v1433_v13, %v628_v23  ;;  %v1974_v0 = vadd.f32 0.18741608, %v851_v52  ;;  %v1976_v63 = vadd.f32 %v248_v17, %v184_v47  ;;  %v660_v40 = vmul.f32 %v659_v41, %v1673_v43 }
 0x108   :  { %v700_v60 = vmul.f32 %v699_v18, %v1701_v11  ;;  %vm631_vm5 = vweird.f32 %v1920_v27  ;;  %v638_v5 = vor.u32 1.1754944e-38, %v637_v16  ;;  %v1981_v61 = vadd.f32 1.0, %v384_v12 }
 0x109   :  { %v1435_v62 = vpop.eup %1434  ;;  %v630_v30 = vadd.f32 %v1433_v13, %v629_v38  ;;  %vm633_vm6 = vmor %vm631_vm5, %vm632_vm4  ;;  %v661_v48 = vadd.f32 0.112945676, %v660_v40  ;;  %v738_v26 = vmul.f32 %v737_v9, %v1733_v53  ;;  %v1985_v59 = vadd.f32 0.0036580483, %v567_v3 }
 0x10a   :  { %v347_v46 = vmul.f32 %v1435_v62, %v1949_v8  ;;  %v701_v57 = vadd.f32 0.112945676, %v700_v60  ;;  %vm636_vm7 = vcmp.eq.f32.partialorder %v635_v25, 8.507059e+37  ;;  %1436 = vrcp.f32 %v1981_v61 }
 0x10b   :  { %v634_v1 = vsel %vm633_vm6, %v1433_v13, %v630_v30  ;;  %v355_v27 = vand.u32 2147483647, %v1949_v8  ;;  %v357_v52 = vand.u32 2147483648, %v1949_v8  ;;  %v1992_v23 = vmul.f32 0.70710677, %v1976_v63 }
 0x10c   :  { %v639_v33 = vsel %vm636_vm7, %v638_v5, %v634_v1  ;;  %v348_v45 = vsub.f32 1.0, %v347_v46  ;;  %v662_v16 = vmul.f32 %v661_v48, %v1673_v43  ;;  %v702_v3 = vmul.f32 %v701_v57, %v1701_v11 }
 0x10d   :  { %v640_v47 = vmul.f32 %v639_v33, %v1841_v55  ;;  %vm352_vm8 = vweird.f32 %v1435_v62  ;;  %v739_v13 = vadd.f32 0.014752088, %v738_v26  ;;  %v416_v35 = vmul.f32 3.8918573e-05, %v1707_v24 }
 0x10e   :  { %v349_v17 = vmul.f32 %v1435_v62, %v348_v45  ;;  %vm351_vm9 = vweird.f32 %v1949_v8  ;;  %v663_v41 = vadd.f32 0.4994258, %v662_v16  ;;  %v703_v18 = vadd.f32 0.4994258, %v702_v3 }
 0x10f   :  { %v1380_v25 = vclamps-f32 %v640_v47, 1.0  ;;  %vm356_vm10 = vcmp.eq.f32.partialorder %v355_v27, 8.507059e+37  ;;  %v358_v55 = vor.u32 1.1754944e-38, %v357_v52  ;;  %v740_v12 = vmul.f32 %v739_v13, %v1733_v53  ;;  %vm353_vm11 = vmor %vm351_vm9, %vm352_vm8 }
 0x110   :  { %v350_v38 = vadd.f32 %v1435_v62, %v349_v17  ;;  %v1437_v9 = vpop.eup %1436  ;;  %v664_v60 = vmul.f32 %v663_v41, %v1673_v43  ;;  %v704_v30 = vmul.f32 %v703_v18, %v1701_v11  ;;  %v456_v5 = vmul.f32 3.8918573e-05, %v1755_v20 }
 0x111   :  { %v931_v40 = vadd.f32 1.0, %v1380_v25  ;;  %v387_v48 = vmul.f32 %v1437_v9, %v1981_v61  ;;  %v395_v8 = vand.u32 2147483647, %v1981_v61  ;;  %v741_v57 = vadd.f32 0.112945676, %v740_v12 }
 0x112   :  { %v354_v46 = vsel %vm353_vm11, %v1435_v62, %v350_v38  ;;  %v2007_v33 = vadd.f32 1.0, %v664_v60  ;;  %v417_v45 = vadd.f32 0.001143296, %v416_v35  ;;  %v2010_v52 = vadd.f32 1.0, %v704_v30 }
 0x113   :  { %v2005_v26 = vmul.f32 %v931_v40, %v1722_v37  ;;  %v359_v1 = vsel %vm356_vm10, %v358_v55, %v354_v46  ;;  %v388_v43 = vsub.f32 1.0, %v387_v48  ;;  %v742_v11 = vmul.f32 %v741_v57, %v1733_v53 }
 0x114   :  { %v360_v27 = vmul.f32 %v359_v1, %v1854_v31  ;;  %v2016_v62 = vmul.f32 %v1992_v23, %v1992_v23  ;;  %v397_v37 = vand.u32 2147483648, %v1981_v61  ;;  %1438 = vrcp.f32 %v2007_v33 }
 0x115   :  { %971 = vadd.xlane.f32.xlu2 %v2005_v26  ;;  %v457_v47 = vadd.f32 0.001143296, %v456_v5  ;;  %v389_v3 = vmul.f32 %v1437_v9, %v388_v43  ;;  %vm392_vm12 = vweird.f32 %v1437_v9  ;;  %1440 = vrcp.f32 %v2010_v52 }
 0x116   :  { %v1373_v16 = vclamps-f32 %v360_v27, 1.0  ;;  %vm391_vm13 = vweird.f32 %v1981_v61  ;;  %vm2022_vm14 = vcmp.eq.f32.partialorder %v395_v8, 8.507059e+37  ;;  %v675_v17 = vand.u32 2147483647, %v2007_v33 }
 0x117   :  { %v677_v13 = vand.u32 2147483648, %v2007_v33  ;;  %v390_v25 = vadd.f32 %v1437_v9, %v389_v3  ;;  %v743_v41 = vadd.f32 0.4994258, %v742_v11  ;;  %v418_v18 = vmul.f32 %v417_v45, %v1707_v24  ;;  %vm393_vm15 = vmor %vm391_vm13, %vm392_vm12 }
 0x118   :  { %v924_v35 = vadd.f32 1.0, %v1373_v16  ;;  %v398_v38 = vor.u32 1.1754944e-38, %v397_v37  ;;  %v715_v55 = vand.u32 2147483647, %v2010_v52  ;;  %v458_v12 = vmul.f32 %v457_v47, %v1755_v20 }
 0x119   :  { %v776_v61 = vmul.f32 3.8918573e-05, %v1776_v51  ;;  %v394_v60 = vsel %vm393_vm15, %v1437_v9, %v390_v25  ;;  %vm671_vm0 = vweird.f32 %v2007_v33  ;;  %v744_v30 = vmul.f32 %v743_v41, %v1733_v53 }
 0x11a   :  { %v2033_v40 = vmul.f32 %v924_v35, %v1745_v7  ;;  %v419_v5 = vadd.f32 0.014752088, %v418_v18  ;;  %v1439_v46 = vpop.eup %1438  ;;  %v399_v48 = vsel %vm2022_vm14, %v398_v38, %v394_v60  ;;  %v678_v8 = vor.u32 1.1754944e-38, %v677_v13 }
 0x11b   :  { %vm711_vm1 = vweird.f32 %v2010_v52  ;;  %v459_v57 = vadd.f32 0.014752088, %v458_v12  ;;  %v1441_v1 = vpop.eup %1440  ;;  %v400_v7 = vmul.f32 %v399_v48, %v1875_v4  ;;  %v667_v9 = vmul.f32 %v1439_v46, %v2007_v33 }
 0x11c   :  { %957 = vadd.xlane.f32.xlu0 %v2033_v40  ;;  %vm2043_vm2 = vcmp.eq.f32.partialorder %v675_v17, 8.507059e+37  ;;  %v2047_v53 = vadd.f32 1.0, %v744_v30  ;;  %v777_v27 = vadd.f32 0.001143296, %v776_v61  ;;  %v707_v43 = vmul.f32 %v1441_v1, %v2010_v52 }
 0x11d   :  { %v717_v11 = vand.u32 2147483648, %v2010_v52  ;;  %v420_v37 = vmul.f32 %v419_v5, %v1707_v24  ;;  %v460_v47 = vmul.f32 %v459_v57, %v1755_v20  ;;  %v1374_v16 = vclamps-f32 %v400_v7, 1.0 }
 0x11e   :  { %v668_v3 = vsub.f32 1.0, %v667_v9  ;;  %vm2053_vm3 = vcmp.eq.f32.partialorder %v715_v55, 8.507059e+37  ;;  %1442 = vrcp.f32 %v2047_v53  ;;  %vm672_vm4 = vweird.f32 %v1439_v46 }
 0x11f   :  { %v708_v31 = vsub.f32 1.0, %v707_v43  ;;  %v421_v17 = vadd.f32 0.112945676, %v420_v37  ;;  %v496_v13 = vmul.f32 3.8918573e-05, %v1789_v6  ;;  %v925_v35 = vadd.f32 1.0, %v1374_v16  ;;  %vm673_vm6 = vmor %vm671_vm0, %vm672_vm4 }
 0x120   :  { %v669_v25 = vmul.f32 %v1439_v46, %v668_v3  ;;  %v461_v41 = vadd.f32 0.112945676, %v460_v47  ;;  %v778_v18 = vmul.f32 %v777_v27, %v1776_v51  ;;  %vm712_vm5 = vweird.f32 %v1441_v1 }
 0x121   :  { %v709_v38 = vmul.f32 %v1441_v1, %v708_v31  ;;  %v718_v12 = vor.u32 1.1754944e-38, %v717_v11  ;;  %v422_v55 = vmul.f32 %v421_v17, %v1707_v24  ;;  %v2062_v61 = vmul.f32 %v925_v35, %v1758_v22  ;;  %vm713_vm8 = vmor %vm711_vm1, %vm712_vm5 }
 0x122   :  { %v670_v60 = vadd.f32 %v1439_v46, %v669_v25  ;;  %v462_v30 = vmul.f32 %v461_v41, %v1755_v20  ;;  %v779_v5 = vadd.f32 0.014752088, %v778_v18  ;;  %vm751_vm7 = vweird.f32 %v2047_v53 }
 0x123   :  { %v710_v48 = vadd.f32 %v1441_v1, %v709_v38  ;;  %v423_v57 = vadd.f32 0.4994258, %v422_v55  ;;  %v497_v7 = vadd.f32 0.001143296, %v496_v13  ;;  %959 = vadd.xlane.f32.xlu1 %v2062_v61  ;;  %v755_v22 = vand.u32 2147483647, %v2047_v53 }
 0x124   :  { %v1443_v9 = vpop.eup %1442  ;;  %v674_v27 = vsel %vm673_vm6, %v1439_v46, %v670_v60  ;;  %v463_v43 = vadd.f32 0.4994258, %v462_v30  ;;  %v780_v11 = vmul.f32 %v779_v5, %v1776_v51  ;;  %v816_v16 = vmul.f32 3.8918573e-05, %v1814_v14 }
 0x125   :  { %v679_v33 = vsel %vm2043_vm2, %v678_v8, %v674_v27  ;;  %v714_v37 = vsel %vm713_vm8, %v1441_v1, %v710_v48  ;;  %v747_v47 = vmul.f32 %v1443_v9, %v2047_v53  ;;  %v424_v52 = vmul.f32 %v423_v57, %v1707_v24 }
 0x126   :  { %v680_v3 = vmul.f32 %v679_v33, %v1868_v50  ;;  %v719_v46 = vsel %vm2053_vm3, %v718_v12, %v714_v37  ;;  %v464_v31 = vmul.f32 %v463_v43, %v1755_v20  ;;  %v781_v35 = vadd.f32 0.112945676, %v780_v11 }
 0x127   :  { %v720_v17 = vmul.f32 %v719_v46, %v1931_v15  ;;  %v748_v13 = vsub.f32 1.0, %v747_v47  ;;  %v498_v8 = vmul.f32 %v497_v7, %v1789_v6  ;;  %v757_v45 = vand.u32 2147483648, %v2047_v53 }
 0x128   :  { %v1381_v1 = vclamps-f32 %v680_v3, 1.0  ;;  %v2087_v25 = vadd.f32 1.0, %v424_v52  ;;  %v2089_v41 = vadd.f32 1.0, %v464_v31  ;;  %vm752_vm9 = vweird.f32 %v1443_v9 }
 0x129   :  { %v1382_v50 = vclamps-f32 %v720_v17, 1.0  ;;  %v749_v4 = vmul.f32 %v1443_v9, %v748_v13  ;;  %v536_v24 = vmul.f32 3.8918573e-05, %v1828_v32  ;;  %v782_v20 = vmul.f32 %v781_v35, %v1776_v51  ;;  %vm753_vm10 = vmor %vm751_vm7, %vm752_vm9 }
 0x12a   :  { %v932_v18 = vadd.f32 1.0, %v1381_v1  ;;  %1444 = vrcp.f32 %v2087_v25  ;;  %v499_v15 = vadd.f32 0.014752088, %v498_v8  ;;  %v817_v55 = vadd.f32 0.001143296, %v816_v16 }
 0x12b   :  { %v933_v38 = vadd.f32 1.0, %v1382_v50  ;;  %v750_v12 = vadd.f32 %v1443_v9, %v749_v4  ;;  %1446 = vrcp.f32 %v2089_v41  ;;  %v2097_v60 = vmul.f32 %v1966_v44, %v1809_v54 }
 0x12c   :  { %v2101_v30 = vmul.f32 %v1985_v59, %v1909_v42  ;;  %v2104_v5 = vmul.f32 %v932_v18, %v1751_v10  ;;  %v758_v48 = vor.u32 1.1754944e-38, %v757_v45  ;;  %vm756_vm11 = vcmp.eq.f32.partialorder %v755_v22, 8.507059e+37 }
 0x12d   :  { %v2109_v57 = vmul.f32 %v933_v38, %v1786_v2  ;;  %v754_v7 = vsel %vm753_vm10, %v1443_v9, %v750_v12  ;;  %v435_v27 = vand.u32 2147483647, %v2087_v25  ;;  %v2113_v54 = vmin.f32 %v2016_v62, 16.0 }
 0x12e   :  { %973 = vadd.xlane.f32.xlu0 %v2104_v5  ;;  %v759_v44 = vsel %vm756_vm11, %v758_v48, %v754_v7  ;;  %v783_v59 = vadd.f32 0.4994258, %v782_v20  ;;  %v500_v10 = vmul.f32 %v499_v15, %v1789_v6  ;;  %vm431_vm12 = vweird.f32 %v2087_v25 }
 0x12f   :  { %975 = vadd.xlane.f32.xlu1 %v2109_v57  ;;  %v760_v53 = vmul.f32 %v759_v44, %v1943_v28  ;;  %v818_v2 = vmul.f32 %v817_v55, %v1814_v14  ;;  %v537_v9 = vadd.f32 0.001143296, %v536_v24  ;;  %v437_v43 = vand.u32 2147483648, %v2087_v25 }
 0x130   :  { %v1445_v22 = vpop.eup %1444  ;;  %vm471_vm13 = vweird.f32 %v2089_v41  ;;  %v784_v62 = vmul.f32 %v783_v59, %v1776_v51  ;;  %v501_v11 = vadd.f32 0.112945676, %v500_v10  ;;  %vm2125_vm14 = vcmp.eq.f32.partialorder %v435_v27, 8.507059e+37 }
 0x131   :  { %v1447_v33 = vpop.eup %1446  ;;  %v1383_v37 = vclamps-f32 %v760_v53, 1.0  ;;  %v427_v47 = vmul.f32 %v1445_v22, %v2087_v25  ;;  %v475_v28 = vand.u32 2147483647, %v2089_v41  ;;  %v819_v3 = vadd.f32 0.014752088, %v818_v2 }
 0x132   :  { %v467_v46 = vmul.f32 %v1447_v33, %v2089_v41  ;;  %v2131_v52 = vadd.f32 1.0, %v784_v62  ;;  %v502_v31 = vmul.f32 %v501_v11, %v1789_v6  ;;  %v856_v51 = vmul.f32 3.8918573e-05, %v1851_v19 }
 0x133   :  { %v934_v17 = vadd.f32 1.0, %v1383_v37  ;;  %v428_v13 = vsub.f32 1.0, %v427_v47  ;;  %v820_v35 = vmul.f32 %v819_v3, %v1814_v14  ;;  %v538_v8 = vmul.f32 %v537_v9, %v1828_v32 }
 0x134   :  { %v438_v1 = vor.u32 1.1754944e-38, %v437_v43  ;;  %v468_v45 = vsub.f32 1.0, %v467_v46  ;;  %v477_v50 = vand.u32 2147483648, %v2089_v41  ;;  %1448 = vrcp.f32 %v2131_v52 }
 0x135   :  { %v2140_v4 = vmul.f32 %v934_v17, %v1844_v56  ;;  %v429_v24 = vmul.f32 %v1445_v22, %v428_v13  ;;  %vm432_vm15 = vweird.f32 %v1445_v22  ;;  %v503_v18 = vadd.f32 0.4994258, %v502_v31 }
 0x136   :  { %v469_v20 = vmul.f32 %v1447_v33, %v468_v45  ;;  %vm472_vm0 = vweird.f32 %v1447_v33  ;;  %v821_v15 = vadd.f32 0.112945676, %v820_v35  ;;  %v539_v38 = vadd.f32 0.014752088, %v538_v8  ;;  %vm433_vm2 = vmor %vm431_vm12, %vm432_vm15 }
 0x137   :  { %977 = vadd.xlane.f32.xlu2 %v2140_v4  ;;  %v430_v12 = vadd.f32 %v1445_v22, %v429_v24  ;;  %vm2143_vm1 = vcmp.eq.f32.partialorder %v475_v28, 8.507059e+37  ;;  %v504_v48 = vmul.f32 %v503_v18, %v1789_v6  ;;  %v857_v7 = vadd.f32 0.001143296, %v856_v51  ;;  %vm473_vm3 = vmor %vm471_vm13, %vm472_vm0  ;;  %v2473_v24 = vld [vmem:[#allocation12_spill] sm:$0xff] }
 0x138   :  { %v470_v56 = vadd.f32 %v1447_v33, %v469_v20  ;;  %v478_v27 = vor.u32 1.1754944e-38, %v477_v50  ;;  %v822_v44 = vmul.f32 %v821_v15, %v1814_v14  ;;  %v540_v59 = vmul.f32 %v539_v38, %v1828_v32 }
 0x139   :  { %v434_v10 = vsel %vm433_vm2, %v1445_v22, %v430_v12  ;;  %v2154_v53 = vadd.f32 1.0, %v504_v48  ;;  %v858_v2 = vmul.f32 %v857_v7, %v1851_v19  ;;  %v576_v6 = vmul.f32 3.8918573e-05, %v1909_v42  ;;  %v2474_v12 = vld [vmem:[#allocation15_spill] sm:$0xff] }
 0x13a   :  { %v1449_v9 = vpop.eup %1448  ;;  %v439_v25 = vsel %vm2125_vm14, %v438_v1, %v434_v10  ;;  %v474_v43 = vsel %vm473_vm3, %v1447_v33, %v470_v56  ;;  %v823_v62 = vadd.f32 0.4994258, %v822_v44  ;;  %v541_v11 = vadd.f32 0.112945676, %v540_v59 }
 0x13b   :  { %v2161_v37 = vadd.f32 0.05243302, %v2101_v30  ;;  %v440_v22 = vmul.f32 %v439_v25, %v1940_v58  ;;  %v479_v41 = vsel %vm2143_vm1, %v478_v27, %v474_v43  ;;  %v787_v47 = vmul.f32 %v1449_v9, %v2131_v52 }
 0x13c   :  { %v885_v28 = vmul.f32 2.1237322e-06, %v2113_v54  ;;  %v480_v3 = vmul.f32 %v479_v41, %v1946_v39  ;;  %v795_v16 = vand.u32 2147483647, %v2131_v52  ;;  %1450 = vrcp.f32 %v2154_v53 }
 0x13d   :  { %v1375_v33 = vclamps-f32 %v440_v22, 1.0  ;;  %v788_v46 = vsub.f32 1.0, %v787_v47  ;;  %v824_v30 = vmul.f32 %v823_v62, %v1814_v14  ;;  %v577_v31 = vadd.f32 0.001143296, %v576_v6 }
 0x13e   :  { %v1376_v51 = vclamps-f32 %v480_v3, 1.0  ;;  %v797_v58 = vand.u32 2147483648, %v2131_v52  ;;  %v542_v17 = vmul.f32 %v541_v11, %v1828_v32  ;;  %v859_v13 = vadd.f32 0.014752088, %v858_v2 }
 0x13f   :  { %v926_v35 = vadd.f32 1.0, %v1375_v33  ;;  %v789_v8 = vmul.f32 %v1449_v9, %v788_v46  ;;  %vm792_vm4 = vweird.f32 %v1449_v9  ;;  %v2174_v1 = vadd.f32 1.0, %v824_v30 }
 0x140   :  { %v927_v39 = vadd.f32 1.0, %v1376_v51  ;;  %vm791_vm5 = vweird.f32 %v2131_v52  ;;  %v543_v45 = vadd.f32 0.4994258, %v542_v17  ;;  %v860_v50 = vmul.f32 %v859_v13, %v1851_v19  ;;  %v2477_v13 = vld [vmem:[#allocation16_spill] sm:$0xff] }
 0x141   :  { %v2179_v14 = vmul.f32 %v926_v35, %v2473_v24  ;;  %v790_v18 = vadd.f32 %v1449_v9, %v789_v8  ;;  %1452 = vrcp.f32 %v2174_v1  ;;  %v578_v20 = vmul.f32 %v577_v31, %v1909_v42  ;;  %vm793_vm6 = vmor %vm791_vm5, %vm792_vm4 }
 0x142   :  { %v1451_v15 = vpop.eup %1450  ;;  %v886_v38 = vadd.f32 0.00028619796, %v885_v28  ;;  %v2184_v55 = vmul.f32 %v927_v39, %v2474_v12  ;;  %v798_v48 = vor.u32 1.1754944e-38, %v797_v58  ;;  %v544_v52 = vmul.f32 %v543_v45, %v1828_v32 }
 0x143   :  { %961 = vadd.xlane.f32.xlu1 %v2179_v14  ;;  %v794_v7 = vsel %vm793_vm6, %v1449_v9, %v790_v18  ;;  %vm796_vm7 = vcmp.eq.f32.partialorder %v795_v16, 8.507059e+37  ;;  %v507_v56 = vmul.f32 %v1451_v15, %v2154_v53  ;;  %v861_v27 = vadd.f32 0.112945676, %v860_v50 }
 0x144   :  { %963 = vadd.xlane.f32.xlu2 %v2184_v55  ;;  %v799_v44 = vsel %vm796_vm7, %v798_v48, %v794_v7  ;;  %v515_v59 = vand.u32 2147483647, %v2154_v53  ;;  %v517_v10 = vand.u32 2147483648, %v2154_v53  ;;  %v2192_v2 = vadd.f32 1.0, %v544_v52 }
 0x145   :  { %v800_v6 = vmul.f32 %v799_v44, %v1955_v49  ;;  %v508_v25 = vsub.f32 1.0, %v507_v56  ;;  %v862_v32 = vmul.f32 %v861_v27, %v1851_v19  ;;  %v579_v43 = vadd.f32 0.014752088, %v578_v20 }
 0x146   :  { %v887_v9 = vmul.f32 %v886_v38, %v2113_v54  ;;  %vm512_vm8 = vweird.f32 %v1451_v15  ;;  %1454 = vrcp.f32 %v2192_v2  ;;  %v896_v62 = vmul.f32 3.8918573e-05, %v2113_v54 }
 0x147   :  { %v1453_v11 = vpop.eup %1452  ;;  %v1384_v22 = vclamps-f32 %v800_v6, 1.0  ;;  %v509_v41 = vmul.f32 %v1451_v15, %v508_v25  ;;  %v863_v47 = vadd.f32 0.4994258, %v862_v32  ;;  %v580_v28 = vmul.f32 %v579_v43, %v1909_v42 }
 0x148   :  { %vm511_vm9 = vweird.f32 %v2154_v53  ;;  %vm2201_vm10 = vcmp.eq.f32.partialorder %v515_v59, 8.507059e+37  ;;  %v518_v3 = vor.u32 1.1754944e-38, %v517_v10  ;;  %v827_v16 = vmul.f32 %v1453_v11, %v2174_v1 }
 0x149   :  { %v935_v33 = vadd.f32 1.0, %v1384_v22  ;;  %v510_v46 = vadd.f32 %v1451_v15, %v509_v41  ;;  %v864_v30 = vmul.f32 %v863_v47, %v1851_v19  ;;  %v581_v31 = vadd.f32 0.112945676, %v580_v28  ;;  %vm513_vm11 = vmor %vm511_vm9, %vm512_vm8  ;;  %v2478_v41 = vld [vmem:[#allocation17_spill] sm:$0xff] }
 0x14a   :  { %v828_v51 = vsub.f32 1.0, %v827_v16  ;;  %v835_v58 = vand.u32 2147483647, %v2174_v1  ;;  %v837_v17 = vand.u32 2147483648, %v2174_v1  ;;  %v897_v53 = vadd.f32 0.001143296, %v896_v62 }
 0x14b   :  { %v2211_v35 = vmul.f32 %v935_v33, %v2477_v13  ;;  %v514_v8 = vsel %vm513_vm11, %v1451_v15, %v510_v46  ;;  %v2213_v39 = vadd.f32 1.0, %v864_v30  ;;  %v582_v45 = vmul.f32 %v581_v31, %v1909_v42 }
 0x14c   :  { %v1455_v50 = vpop.eup %1454  ;;  %v519_v24 = vsel %vm2201_vm10, %v518_v3, %v514_v8  ;;  %v829_v18 = vmul.f32 %v1453_v11, %v828_v51  ;;  %vm832_vm12 = vweird.f32 %v1453_v11  ;;  %v898_v20 = vmul.f32 %v897_v53, %v2113_v54 }
 0x14d   :  { %v888_v38 = vadd.f32 0.0036580483, %v887_v9  ;;  %979 = vadd.xlane.f32.xlu0 %v2211_v35  ;;  %v520_v12 = vmul.f32 %v519_v24, %v1961_v21  ;;  %v547_v48 = vmul.f32 %v1455_v50, %v2192_v2  ;;  %1456 = vrcp.f32 %v2213_v39 }
 0x14e   :  { %v830_v15 = vadd.f32 %v1453_v11, %v829_v18  ;;  %vm831_vm13 = vweird.f32 %v2174_v1  ;;  %vm836_vm14 = vcmp.eq.f32.partialorder %v835_v58, 8.507059e+37  ;;  %v838_v52 = vor.u32 1.1754944e-38, %v837_v17  ;;  %v2479_v18 = vld [vmem:[#allocation11_spill] sm:$0xff] }
 0x14f   :  { %v1377_v7 = vclamps-f32 %v520_v12, 1.0  ;;  %vm833_vm15 = vmor %vm831_vm13, %vm832_vm12  ;;  %v548_v56 = vsub.f32 1.0, %v547_v48  ;;  %v583_v27 = vadd.f32 0.4994258, %v582_v45  ;;  %v899_v44 = vadd.f32 0.014752088, %v898_v20 }
 0x150   :  { %v834_v59 = vsel %vm833_vm15, %v1453_v11, %v830_v15  ;;  %vm552_vm0 = vweird.f32 %v1455_v50  ;;  %v555_v10 = vand.u32 2147483647, %v2192_v2  ;;  %v557_v21 = vand.u32 2147483648, %v2192_v2 }
 0x151   :  { %v928_v6 = vadd.f32 1.0, %v1377_v7  ;;  %v839_v25 = vsel %vm836_vm14, %v838_v52, %v834_v59  ;;  %v549_v32 = vmul.f32 %v1455_v50, %v548_v56  ;;  %v584_v43 = vmul.f32 %v583_v27, %v1909_v42  ;;  %v2480_v52 = vld [vmem:[#allocation14_spill] sm:$0xff] }
 0x152   :  { %v853_v1 = vmul.f32 %v1974_v0, %v1851_v19  ;;  %v571_v9 = vmul.f32 %v2161_v37, %v1909_v42  ;;  %v840_v62 = vmul.f32 %v839_v25, %v1970_v29  ;;  %v900_v11 = vmul.f32 %v899_v44, %v2113_v54 }
 0x153   :  { %v1457_v22 = vpop.eup %1456  ;;  %v2234_v47 = vmul.f32 %v928_v6, %v2478_v41  ;;  %v550_v28 = vadd.f32 %v1455_v50, %v549_v32  ;;  %vm551_vm1 = vweird.f32 %v2192_v2  ;;  %v2237_v49 = vadd.f32 1.0, %v584_v43 }
 0x154   :  { %v1385_v3 = vclamps-f32 %v840_v62, 1.0  ;;  %vm553_vm2 = vmor %vm551_vm1, %vm552_vm0  ;;  %v558_v19 = vor.u32 1.1754944e-38, %v557_v21  ;;  %v867_v0 = vmul.f32 %v1457_v22, %v2213_v39  ;;  %v901_v37 = vadd.f32 0.112945676, %v900_v11  ;;  %v2481_v62 = vld [vmem:[#allocation13_spill] sm:$0xff] }
 0x155   :  { %v889_v29 = vmul.f32 %v888_v38, %v2113_v54  ;;  %965 = vadd.xlane.f32.xlu2 %v2234_v47  ;;  %v554_v16 = vsel %vm553_vm2, %v1455_v50, %v550_v28  ;;  %vm556_vm3 = vcmp.eq.f32.partialorder %v555_v10, 8.507059e+37  ;;  %1458 = vrcp.f32 %v2237_v49 }
 0x156   :  { %v854_v33 = vadd.f32 1.1283791, %v853_v1  ;;  %v936_v46 = vadd.f32 1.0, %v1385_v3  ;;  %v559_v2 = vsel %vm556_vm3, %v558_v19, %v554_v16  ;;  %v868_v30 = vsub.f32 1.0, %v867_v0  ;;  %v2482_v3 = vld [vmem:[#allocation19_spill] sm:$0xff] }
 0x157   :  { %v572_v31 = vadd.f32 0.18741608, %v571_v9  ;;  %v560_v51 = vmul.f32 %v559_v2, %v2097_v60  ;;  %v877_v58 = vand.u32 2147483648, %v2213_v39  ;;  %v902_v17 = vmul.f32 %v901_v37, %v2113_v54 }
 0x158   :  { %v2248_v53 = vmul.f32 %v936_v46, %v1905_v36  ;;  %v869_v13 = vmul.f32 %v1457_v22, %v868_v30  ;;  %vm872_vm4 = vweird.f32 %v1457_v22  ;;  %v875_v8 = vand.u32 2147483647, %v2213_v39 }
 0x159   :  { %v890_v45 = vadd.f32 0.05243302, %v889_v29  ;;  %v1378_v50 = vclamps-f32 %v560_v51, 1.0  ;;  %v903_v24 = vadd.f32 0.4994258, %v902_v17  ;;  %v257_v20 = vmul.f32 0.5, %v2479_v18 }
 0x15a   :  { %981 = vadd.xlane.f32.xlu1 %v2248_v53  ;;  %v870_v38 = vadd.f32 %v1457_v22, %v869_v13  ;;  %vm871_vm5 = vweird.f32 %v2213_v39  ;;  %v573_v12 = vmul.f32 %v572_v31, %v1909_v42  ;;  %v878_v36 = vor.u32 1.1754944e-38, %v877_v58  ;;  %v2483_v51 = vld [vmem:[#allocation18_spill] sm:$0xff] }
 0x15b   :  { %v1459_v60 = vpop.eup %1458  ;;  %v929_v48 = vadd.f32 1.0, %v1378_v50  ;;  %vm873_vm6 = vmor %vm871_vm5, %vm872_vm4  ;;  %v904_v15 = vmul.f32 %v903_v24, %v2113_v54  ;;  %v855_v7 = vmul.f32 %v854_v33, %v2480_v52  ;;  %vm876_vm7 = vcmp.eq.f32.partialorder %v875_v8, 8.507059e+37 }
 0x15c   :  { %v874_v56 = vsel %vm873_vm6, %v1457_v22, %v870_v38  ;;  %v587_v27 = vmul.f32 %v1459_v60, %v2237_v49  ;;  %v891_v44 = vmul.f32 %v890_v45, %v2113_v54  ;;  %v574_v42 = vadd.f32 1.1283791, %v573_v12 }
 0x15d   :  { %v2259_v59 = vmul.f32 %v929_v48, %v257_v20  ;;  %v879_v10 = vsel %vm876_vm7, %v878_v36, %v874_v56  ;;  %v905_v39 = vadd.f32 1.0, %v904_v15  ;;  %v597_v25 = vand.u32 2147483648, %v2237_v49 }
 0x15e   :  { %v880_v21 = vmul.f32 %v879_v10, %v855_v7  ;;  %v588_v6 = vsub.f32 1.0, %v587_v27  ;;  %vm592_vm8 = vweird.f32 %v1459_v60  ;;  %v595_v1 = vand.u32 2147483647, %v2237_v49 }
 0x15f   :  { %967 = vadd.xlane.f32.xlu0 %v2259_v59  ;;  %1460 = vrcp.f32 %v905_v39  ;;  %v892_v9 = vadd.f32 0.18741608, %v891_v44  ;;  %v265_v11 = vmul.f32 0.5, %v2481_v62  ;;  %vm591_vm9 = vweird.f32 %v2237_v49 }
 0x160   :  { %v1386_v32 = vclamps-f32 %v880_v21, 1.0  ;;  %v589_v43 = vmul.f32 %v1459_v60, %v588_v6  ;;  %vm593_vm10 = vmor %vm591_vm9, %vm592_vm8  ;;  %v598_v28 = vor.u32 1.1754944e-38, %v597_v25  ;;  %v575_v19 = vmul.f32 %v574_v42, %v2482_v3 }
 0x161   :  { %vm596_vm11 = vcmp.eq.f32.partialorder %v595_v1, 8.507059e+37  ;;  %v893_v16 = vmul.f32 %v892_v9, %v2113_v54  ;;  %v258_v49 = vmul.f32 0.5, %v2483_v51  ;;  %v917_v17 = vand.u32 2147483648, %v905_v39 }
 0x162   :  { %v937_v22 = vadd.f32 1.0, %v1386_v32  ;;  %v590_v41 = vadd.f32 %v1459_v60, %v589_v43  ;;  %v915_v45 = vand.u32 2147483647, %v905_v39  ;;  %v1003_v50 = vlaneseq }
 0x163   :  { %v894_v58 = vadd.f32 1.1283791, %v893_v16  ;;  %vm911_vm13 = vweird.f32 %v905_v39  ;;  %v918_v54 = vor.u32 1.1754944e-38, %v917_v17  ;;  %v266_v56 = vmul.f32 0.5, %v1976_v63 }
 0x164   :  { %v2267_v0 = vmul.f32 %v937_v22, %v265_v11  ;;  %v594_v37 = vsel %vm593_vm10, %v1459_v60, %v590_v41  ;;  %vm916_vm15 = vcmp.eq.f32.partialorder %v915_v45, 8.507059e+37  ;;  %v2276_v60 = vand.u32 127, %v1003_v50 }
 0x165   :  { %v1461_v29 = vpop.eup %1460  ;;  %v599_v33 = vsel %vm596_vm11, %v598_v28, %v594_v37  ;;  %v895_v20 = vmul.f32 %v894_v58, %v1992_v23 }
 0x166   :  { %983 = vadd.xlane.f32.xlu2 %v2267_v0  ;;  %v600_v46 = vmul.f32 %v599_v33, %v575_v19  ;;  %v907_v2 = vmul.f32 %v1461_v29, %v905_v39  ;;  %vm912_vm12 = vweird.f32 %v1461_v29  ;;  %vm1005_vm0 = vcmp.lt.s32.totalorder %v2276_v60, 32 }
 0x167   :  { %vm913_vm14 = vmor %vm911_vm13, %vm912_vm12 }
 0x168   :  { %v1379_v30 = vclamps-f32 %v600_v46, 1.0  ;;  %v908_v31 = vsub.f32 1.0, %v907_v2 }
 0x16a   :  { %v930_v13 = vadd.f32 1.0, %v1379_v30  ;;  %v909_v8 = vmul.f32 %v1461_v29, %v908_v31 }
 0x16c   :  { %v2272_v24 = vmul.f32 %v930_v13, %v258_v49  ;;  %v910_v18 = vadd.f32 %v1461_v29, %v909_v8 }
 0x16e   :  { %969 = vadd.xlane.f32.xlu1 %v2272_v24  ;;  %v914_v38 = vsel %vm913_vm14, %v1461_v29, %v910_v18 }
 0x16f   :  { %v919_v12 = vsel %vm916_vm15, %v918_v54, %v914_v38  ;;  %v956_v36 = vpop.xlane.xlu0 %955 }
 0x170   :  { %v920_v48 = vmul.f32 %v919_v12, %v895_v20  ;;  %v987_v15 = vmul.f32 0.03125, %v956_v36 }
 0x172   :  { %v1387_v52 = vclamps-f32 %v920_v48, 1.0  ;;  %v2280_v7 = vsub.f32 %v1923_v34, %v987_v15 }
 0x174   :  { %v938_v27 = vadd.f32 1.0, %v1387_v52  ;;  %v1024_v23 = vsel %vm1005_vm0, %v2280_v7, 0.0 }
 0x175   :  { %v1040_v10 = vmul.f32 %v1024_v23, %v1024_v23 }
 0x176   :  { %v2286_v44 = vmul.f32 %v938_v27, %v266_v56 }
 0x177   :  { %1056 = vadd.xlane.f32.xlu1 %v1040_v10 }
 0x178   :  { %985 = vadd.xlane.f32.xlu0 %v2286_v44 }
 0x188   :  { %v972_v39 = vpop.xlane.xlu2 %971 }
 0x189   :  { %v995_v21 = vmul.f32 0.03125, %v972_v39 }
 0x18b   :  { %v2290_v6 = vsub.f32 %v2005_v26, %v995_v21 }
 0x18d   :  { %v1032_v34 = vsel %vm1005_vm0, %v2290_v6, 0.0 }
 0x18e   :  { %v1048_v63 = vmul.f32 %v1032_v34, %v1032_v34 }
 0x18f   :  { %v958_v42 = vpop.xlane.xlu0 %957 }
 0x190   :  { %v988_v25 = vmul.f32 0.03125, %v958_v42  ;;  %1072 = vadd.xlane.f32.xlu0 %v1048_v63 }
 0x192   :  { %v2296_v32 = vsub.f32 %v2033_v40, %v988_v25 }
 0x194   :  { %v1025_v43 = vsel %vm1005_vm0, %v2296_v32, 0.0 }
 0x195   :  { %v1041_v1 = vmul.f32 %v1025_v43, %v1025_v43 }
 0x196   :  { %v960_v9 = vpop.xlane.xlu1 %959 }
 0x197   :  { %1058 = vadd.xlane.f32.xlu2 %v1041_v1  ;;  %v989_v26 = vmul.f32 0.03125, %v960_v9 }
 0x199   :  { %v2302_v62 = vsub.f32 %v2062_v61, %v989_v26 }
 0x19b   :  { %v1026_v11 = vsel %vm1005_vm0, %v2302_v62, 0.0 }
 0x19c   :  { %v1042_v22 = vmul.f32 %v1026_v11, %v1026_v11 }
 0x19e   :  { %1060 = vadd.xlane.f32.xlu0 %v1042_v22 }
 0x1a1   :  { %v974_v41 = vpop.xlane.xlu0 %973 }
 0x1a2   :  { %v996_v40 = vmul.f32 0.03125, %v974_v41  ;;  %v976_v28 = vpop.xlane.xlu1 %975 }
 0x1a3   :  { %v997_v3 = vmul.f32 0.03125, %v976_v28 }
 0x1a4   :  { %v2308_v19 = vsub.f32 %v2104_v5, %v996_v40 }
 0x1a5   :  { %v2311_v37 = vsub.f32 %v2109_v57, %v997_v3 }
 0x1a6   :  { %v1033_v61 = vsel %vm1005_vm0, %v2308_v19, 0.0 }
 0x1a7   :  { %v1049_v29 = vmul.f32 %v1033_v61, %v1033_v61  ;;  %v1034_v16 = vsel %vm1005_vm0, %v2311_v37, 0.0 }
 0x1a8   :  { %v1050_v33 = vmul.f32 %v1034_v16, %v1034_v16 }
 0x1a9   :  { %1074 = vadd.xlane.f32.xlu1 %v1049_v29 }
 0x1aa   :  { %v978_v46 = vpop.xlane.xlu2 %977  ;;  %1076 = vadd.xlane.f32.xlu2 %v1050_v33 }
 0x1ab   :  { %v998_v2 = vmul.f32 0.03125, %v978_v46 }
 0x1ad   :  { %v2320_v5 = vsub.f32 %v2140_v4, %v998_v2 }
 0x1af   :  { %v1035_v57 = vsel %vm1005_vm0, %v2320_v5, 0.0 }
 0x1b0   :  { %v1051_v30 = vmul.f32 %v1035_v57, %v1035_v57 }
 0x1b2   :  { %1078 = vadd.xlane.f32.xlu0 %v1051_v30  ;;  %v2387_v30 = vld [vmem:[%s2447_s4] ss:$0 sm:$0xff] }
 0x1b6   :  { %v962_v31 = vpop.xlane.xlu1 %961 }
 0x1b7   :  { %v990_v51 = vmul.f32 0.03125, %v962_v31  ;;  %v964_v49 = vpop.xlane.xlu2 %963 }
 0x1b8   :  { %v991_v58 = vmul.f32 0.03125, %v964_v49 }
 0x1b9   :  { %v2326_v17 = vsub.f32 %v2179_v14, %v990_v51 }
 0x1ba   :  { %v2329_v13 = vsub.f32 %v2184_v55, %v991_v58 }
 0x1bb   :  { %v1027_v4 = vsel %vm1005_vm0, %v2326_v17, 0.0 }
 0x1bc   :  { %v1043_v8 = vmul.f32 %v1027_v4, %v1027_v4  ;;  %v1028_v45 = vsel %vm1005_vm0, %v2329_v13, 0.0 }
 0x1bd   :  { %v1044_v50 = vmul.f32 %v1028_v45, %v1028_v45 }
 0x1be   :  { %1062 = vadd.xlane.f32.xlu1 %v1043_v8 }
 0x1bf   :  { %1064 = vadd.xlane.f32.xlu2 %v1044_v50 }
 0x1c0   :  { %v980_v18 = vpop.xlane.xlu0 %979 }
 0x1c1   :  { %v999_v54 = vmul.f32 0.03125, %v980_v18 }
 0x1c3   :  { %v2338_v14 = vsub.f32 %v2211_v35, %v999_v54 }
 0x1c5   :  { %v1036_v55 = vsel %vm1005_vm0, %v2338_v14, 0.0 }
 0x1c6   :  { %v1052_v20 = vmul.f32 %v1036_v55, %v1036_v55 }
 0x1c8   :  { %v966_v38 = vpop.xlane.xlu2 %965  ;;  %1080 = vadd.xlane.f32.xlu1 %v1052_v20 }
 0x1c9   :  { %v992_v12 = vmul.f32 0.03125, %v966_v38 }
 0x1cb   :  { %v2344_v48 = vsub.f32 %v2234_v47, %v992_v12 }
 0x1cd   :  { %v1029_v36 = vsel %vm1005_vm0, %v2344_v48, 0.0  ;;  %v982_v10 = vpop.xlane.xlu1 %981 }
 0x1ce   :  { %v1045_v15 = vmul.f32 %v1029_v36, %v1029_v36  ;;  %v1000_v25 = vmul.f32 0.03125, %v982_v10 }
 0x1d0   :  { %1066 = vadd.xlane.f32.xlu0 %v1045_v15 }
 0x1d2   :  { %v968_v52 = vpop.xlane.xlu0 %967 }
 0x1d3   :  { %v993_v35 = vmul.f32 0.03125, %v968_v52 }
 0x1d5   :  { %v2350_v56 = vsub.f32 %v2259_v59, %v993_v35 }
 0x1d7   :  { %v1030_v27 = vsel %vm1005_vm0, %v2350_v56, 0.0 }
 0x1d8   :  { %v1046_v23 = vmul.f32 %v1030_v27, %v1030_v27 }
 0x1d9   :  { %v984_v39 = vpop.xlane.xlu2 %983 }
 0x1da   :  { %v1001_v47 = vmul.f32 0.03125, %v984_v39  ;;  %1068 = vadd.xlane.f32.xlu1 %v1046_v23 }
 0x1dc   :  { %v2356_v21 = vsub.f32 %v2267_v0, %v1001_v47  ;;  %v2368_v0 = vsub.f32 %v2248_v53, %v1000_v25 }
 0x1de   :  { %v1038_v34 = vsel %vm1005_vm0, %v2356_v21, 0.0  ;;  %v1037_v41 = vsel %vm1005_vm0, %v2368_v0, 0.0 }
 0x1df   :  { %v1054_v63 = vmul.f32 %v1038_v34, %v1038_v34  ;;  %v1053_v3 = vmul.f32 %v1037_v41, %v1037_v41 }
 0x1e1   :  { %v970_v42 = vpop.xlane.xlu1 %969  ;;  %1084 = vadd.xlane.f32.xlu0 %v1054_v63 }
 0x1e2   :  { %v994_v59 = vmul.f32 0.03125, %v970_v42 }
 0x1e4   :  { %v2362_v43 = vsub.f32 %v2272_v24, %v994_v59 }
 0x1e6   :  { %v1031_v1 = vsel %vm1005_vm0, %v2362_v43, 0.0 }
 0x1e7   :  { %v1047_v9 = vmul.f32 %v1031_v1, %v1031_v1 }
 0x1e9   :  { %1070 = vadd.xlane.f32.xlu2 %v1047_v9 }
 0x1ea   :  { %v1057_v11 = vpop.xlane.xlu1 %1056 }
 0x1eb   :  { %v986_v26 = vpop.xlane.xlu0 %985  ;;  %v1088_v40 = vmul.f32 0.03125, %v1057_v11 }
 0x1ec   :  { %v1002_v22 = vmul.f32 0.03125, %v986_v26 }
 0x1ed   :  { %v1104_v28 = vadd.f32 1e-05, %v1088_v40 }
 0x1ee   :  { %v2374_v24 = vsub.f32 %v2286_v44, %v1002_v22  ;;  %v2382_v44 = vld [vmem:[%s2446_s3] ss:$0 sm:$0xff]  ;;  %s1578_s3 = smov [#allocation7]  }
 0x1ef   :  { %1462 = vrsqrt.f32 %v1104_v28  ;;  %vm1126_vm2 = vweird.f32 %v1104_v28  ;;  %s1356_s4 = sshll.u32 %s1578_s3, 4  ;;  %s1357_s4 = int_to_ptr.vmem [resolvable:$true] %s1356_s4 }
 0x1f0   :  { %v1039_v61 = vsel %vm1005_vm0, %v2374_v24, 0.0 }
 0x1f1   :  { %v1055_v53 = vmul.f32 %v1039_v61, %v1039_v61  ;;  %1082 = vadd.xlane.f32.xlu2 %v1053_v3 }
 0x1f3   :  { %1086 = vadd.xlane.f32.xlu1 %v1055_v53 }
 0x1f5   :  { %v1463_v29 = vpop.eup %1462 }
 0x1f6   :  { %v1121_v16 = vmul.f32 %v1463_v29, %v1104_v28  ;;  %vm1127_vm1 = vweird.f32 %v1463_v29 }
 0x1f7   :  { %vm1128_vm3 = vmor %vm1126_vm2, %vm1127_vm1 }
 0x1f8   :  { %v1122_v33 = vmul.f32 %v1463_v29, %v1121_v16 }
 0x1fa   :  { %v1123_v46 = vmul.f32 0.5, %v1122_v33 }
 0x1fc   :  { %v1124_v2 = vsub.f32 1.5, %v1123_v46 }
 0x1fe   :  { %v1125_v57 = vmul.f32 %v1463_v29, %v1124_v2 }
 0x200   :  { %v1129_v60 = vsel %vm1128_vm3, %v1463_v29, %v1125_v57 }
 0x201   :  { %v1280_v31 = vmul.f32 %v1129_v60, %v2280_v7 }
 0x203   :  { %v1073_v51 = vpop.xlane.xlu0 %1072  ;;  %v1300_v49 = vmul.f32 %v2382_v44, %v1280_v31 }
 0x204   :  { %v1096_v58 = vmul.f32 0.03125, %v1073_v51 }
 0x205   :  { %v1320_v4 = vadd.f32 %v2387_v30, %v1300_v49 }
 0x206   :  { %v1112_v8 = vadd.f32 1e-05, %v1096_v58 }
 0x207   :  { %1336 = vst [vmem:[#allocation7] sm:$0xff] %v1320_v4 }
 0x208   :  { %1464 = vrsqrt.f32 %v1112_v8  ;;  %vm1206_vm5 = vweird.f32 %v1112_v8 }
 0x20a   :  { %v1059_v45 = vpop.xlane.xlu2 %1058 }
 0x20b   :  { %v1089_v50 = vmul.f32 0.03125, %v1059_v45 }
 0x20d   :  { %v1105_v18 = vadd.f32 1e-05, %v1089_v50 }
 0x20e   :  { %v1465_v54 = vpop.eup %1464 }
 0x20f   :  { %v1201_v55 = vmul.f32 %v1465_v54, %v1112_v8  ;;  %1466 = vrsqrt.f32 %v1105_v18  ;;  %vm1207_vm4 = vweird.f32 %v1465_v54  ;;  %vm1136_vm8 = vweird.f32 %v1105_v18 }
 0x210   :  { %vm1208_vm6 = vmor %vm1206_vm5, %vm1207_vm4 }
 0x211   :  { %v1202_v20 = vmul.f32 %v1465_v54, %v1201_v55  ;;  %v1061_v35 = vpop.xlane.xlu0 %1060 }
 0x212   :  { %v1090_v23 = vmul.f32 0.03125, %v1061_v35 }
 0x213   :  { %v1203_v38 = vmul.f32 0.5, %v1202_v20 }
 0x214   :  { %v1106_v47 = vadd.f32 1e-05, %v1090_v23 }
 0x215   :  { %v1467_v12 = vpop.eup %1466  ;;  %v1204_v36 = vsub.f32 1.5, %v1203_v38 }
 0x216   :  { %v1131_v7 = vmul.f32 %v1467_v12, %v1105_v18  ;;  %vm1137_vm7 = vweird.f32 %v1467_v12  ;;  %1468 = vrsqrt.f32 %v1106_v47  ;;  %vm1146_vm11 = vweird.f32 %v1106_v47 }
 0x217   :  { %v1205_v15 = vmul.f32 %v1465_v54, %v1204_v36  ;;  %vm1138_vm9 = vmor %vm1136_vm8, %vm1137_vm7 }
 0x218   :  { %v1132_v52 = vmul.f32 %v1467_v12, %v1131_v7 }
 0x219   :  { %v1209_v27 = vsel %vm1208_vm6, %v1465_v54, %v1205_v15 }
 0x21a   :  { %v1288_v10 = vmul.f32 %v1209_v27, %v2290_v6  ;;  %v1133_v39 = vmul.f32 0.5, %v1132_v52 }
 0x21c   :  { %v1308_v34 = vmul.f32 %v2382_v44, %v1288_v10  ;;  %v1134_v63 = vsub.f32 1.5, %v1133_v39  ;;  %v1075_v42 = vpop.xlane.xlu1 %1074  ;;  %v1469_v40 = vpop.eup %1468 }
 0x21d   :  { %v1097_v59 = vmul.f32 0.03125, %v1075_v42  ;;  %v1077_v25 = vpop.xlane.xlu2 %1076  ;;  %v1141_v3 = vmul.f32 %v1469_v40, %v1106_v47  ;;  %vm1147_vm10 = vweird.f32 %v1469_v40 }
 0x21e   :  { %v1328_v1 = vadd.f32 %v2387_v30, %v1308_v34  ;;  %v1135_v9 = vmul.f32 %v1467_v12, %v1134_v63  ;;  %v1098_v26 = vmul.f32 0.03125, %v1077_v25  ;;  %vm1148_vm12 = vmor %vm1146_vm11, %vm1147_vm10 }
 0x21f   :  { %v1113_v11 = vadd.f32 1e-05, %v1097_v59  ;;  %v1142_v29 = vmul.f32 %v1469_v40, %v1141_v3 }
 0x220   :  { %1344 = vst [vmem:[#allocation7 + $0x40] sm:$0xff] %v1328_v1  ;;  %v1139_v22 = vsel %vm1138_vm9, %v1467_v12, %v1135_v9  ;;  %v1114_v6 = vadd.f32 1e-05, %v1098_v26 }
 0x221   :  { %v1281_v41 = vmul.f32 %v1139_v22, %v2296_v32  ;;  %1470 = vrsqrt.f32 %v1113_v11  ;;  %v1143_v57 = vmul.f32 0.5, %v1142_v29  ;;  %vm1216_vm15 = vweird.f32 %v1113_v11 }
 0x222   :  { %1472 = vrsqrt.f32 %v1114_v6  ;;  %vm1226_vm1 = vweird.f32 %v1114_v6 }
 0x223   :  { %v1301_v28 = vmul.f32 %v2382_v44, %v1281_v41  ;;  %v1144_v32 = vsub.f32 1.5, %v1143_v57 }
 0x225   :  { %v1321_v61 = vadd.f32 %v2387_v30, %v1301_v28  ;;  %v1079_v53 = vpop.xlane.xlu0 %1078  ;;  %v1145_v4 = vmul.f32 %v1469_v40, %v1144_v32 }
 0x226   :  { %v1099_v16 = vmul.f32 0.03125, %v1079_v53 }
 0x227   :  { %v1471_v33 = vpop.eup %1470  ;;  %1337 = vst [vmem:[#allocation7 + $0x8] sm:$0xff] %v1321_v61  ;;  %v1149_v50 = vsel %vm1148_vm12, %v1469_v40, %v1145_v4 }
 0x228   :  { %v1473_v46 = vpop.eup %1472  ;;  %v1211_v2 = vmul.f32 %v1471_v33, %v1113_v11  ;;  %v1115_v60 = vadd.f32 1e-05, %v1099_v16  ;;  %vm1217_vm13 = vweird.f32 %v1471_v33  ;;  %v1282_v18 = vmul.f32 %v1149_v50, %v2302_v62 }
 0x229   :  { %v1221_v31 = vmul.f32 %v1473_v46, %v1114_v6  ;;  %vm1227_vm14 = vweird.f32 %v1473_v46  ;;  %vm1218_vm0 = vmor %vm1216_vm15, %vm1217_vm13 }
 0x22a   :  { %v1212_v51 = vmul.f32 %v1471_v33, %v1211_v2  ;;  %1474 = vrsqrt.f32 %v1115_v60  ;;  %v1302_v38 = vmul.f32 %v2382_v44, %v1282_v18  ;;  %vm1228_vm2 = vmor %vm1226_vm1, %vm1227_vm14  ;;  %vm1236_vm4 = vweird.f32 %v1115_v60 }
 0x22b   :  { %v1222_v49 = vmul.f32 %v1473_v46, %v1221_v31 }
 0x22c   :  { %v1213_v58 = vmul.f32 0.5, %v1212_v51  ;;  %v1322_v62 = vadd.f32 %v2387_v30, %v1302_v38 }
 0x22d   :  { %v1223_v8 = vmul.f32 0.5, %v1222_v49 }
 0x22e   :  { %v1214_v45 = vsub.f32 1.5, %v1213_v58  ;;  %1338 = vst [vmem:[#allocation7 + $0x10] sm:$0xff] %v1322_v62 }
 0x22f   :  { %v1224_v54 = vsub.f32 1.5, %v1223_v8 }
 0x230   :  { %v1475_v55 = vpop.eup %1474  ;;  %v1215_v20 = vmul.f32 %v1471_v33, %v1214_v45 }
 0x231   :  { %v1225_v12 = vmul.f32 %v1473_v46, %v1224_v54  ;;  %v1231_v36 = vmul.f32 %v1475_v55, %v1115_v60  ;;  %v1063_v7 = vpop.xlane.xlu1 %1062  ;;  %vm1237_vm3 = vweird.f32 %v1475_v55 }
 0x232   :  { %v1219_v15 = vsel %vm1218_vm0, %v1471_v33, %v1215_v20  ;;  %v1091_v52 = vmul.f32 0.03125, %v1063_v7  ;;  %v1065_v35 = vpop.xlane.xlu2 %1064  ;;  %vm1238_vm5 = vmor %vm1236_vm4, %vm1237_vm3 }
 0x233   :  { %v1289_v27 = vmul.f32 %v1219_v15, %v2308_v19  ;;  %v1229_v23 = vsel %vm1228_vm2, %v1473_v46, %v1225_v12  ;;  %v1232_v10 = vmul.f32 %v1475_v55, %v1231_v36  ;;  %v1092_v34 = vmul.f32 0.03125, %v1065_v35 }
 0x234   :  { %v1290_v39 = vmul.f32 %v1229_v23, %v2311_v37  ;;  %v1107_v47 = vadd.f32 1e-05, %v1091_v52 }
 0x235   :  { %v1309_v63 = vmul.f32 %v2382_v44, %v1289_v27  ;;  %v1233_v42 = vmul.f32 0.5, %v1232_v10  ;;  %v1108_v25 = vadd.f32 1e-05, %v1092_v34 }
 0x236   :  { %v1310_v59 = vmul.f32 %v2382_v44, %v1290_v39  ;;  %1476 = vrsqrt.f32 %v1107_v47  ;;  %vm1156_vm7 = vweird.f32 %v1107_v47 }
 0x237   :  { %v1329_v1 = vadd.f32 %v2387_v30, %v1309_v63  ;;  %v1234_v9 = vsub.f32 1.5, %v1233_v42  ;;  %1478 = vrsqrt.f32 %v1108_v25  ;;  %vm1166_vm10 = vweird.f32 %v1108_v25 }
 0x238   :  { %v1330_v19 = vadd.f32 %v2387_v30, %v1310_v59 }
 0x239   :  { %1345 = vst [vmem:[#allocation7 + $0x48] sm:$0xff] %v1329_v1  ;;  %v1235_v26 = vmul.f32 %v1475_v55, %v1234_v9 }
 0x23a   :  { %1346 = vst [vmem:[#allocation7 + $0x50] sm:$0xff] %v1330_v19 }
 0x23b   :  { %v1239_v37 = vsel %vm1238_vm5, %v1475_v55, %v1235_v26  ;;  %v1081_v11 = vpop.xlane.xlu1 %1080 }
 0x23c   :  { %v1477_v22 = vpop.eup %1476  ;;  %v1291_v6 = vmul.f32 %v1239_v37, %v2320_v5  ;;  %v1100_v41 = vmul.f32 0.03125, %v1081_v11 }
 0x23d   :  { %v1151_v40 = vmul.f32 %v1477_v22, %v1107_v47  ;;  %v1479_v28 = vpop.eup %1478  ;;  %vm1157_vm6 = vweird.f32 %v1477_v22 }
 0x23e   :  { %v1311_v3 = vmul.f32 %v2382_v44, %v1291_v6  ;;  %v1116_v61 = vadd.f32 1e-05, %v1100_v41  ;;  %v1161_v29 = vmul.f32 %v1479_v28, %v1108_v25  ;;  %vm1167_vm8 = vweird.f32 %v1479_v28  ;;  %vm1158_vm9 = vmor %vm1156_vm7, %vm1157_vm6 }
 0x23f   :  { %v1152_v53 = vmul.f32 %v1477_v22, %v1151_v40  ;;  %vm1168_vm11 = vmor %vm1166_vm10, %vm1167_vm8 }
 0x240   :  { %v1331_v16 = vadd.f32 %v2387_v30, %v1311_v3  ;;  %1480 = vrsqrt.f32 %v1116_v61  ;;  %v1162_v46 = vmul.f32 %v1479_v28, %v1161_v29  ;;  %vm1246_vm13 = vweird.f32 %v1116_v61 }
 0x241   :  { %v1153_v33 = vmul.f32 0.5, %v1152_v53 }
 0x242   :  { %1347 = vst [vmem:[#allocation7 + $0x58] sm:$0xff] %v1331_v16  ;;  %v1163_v57 = vmul.f32 0.5, %v1162_v46 }
 0x243   :  { %v1154_v2 = vsub.f32 1.5, %v1153_v33  ;;  %v1067_v60 = vpop.xlane.xlu0 %1066 }
 0x244   :  { %v1093_v31 = vmul.f32 0.03125, %v1067_v60  ;;  %v1164_v51 = vsub.f32 1.5, %v1163_v57 }
 0x245   :  { %v1155_v5 = vmul.f32 %v1477_v22, %v1154_v2 }
 0x246   :  { %v1481_v32 = vpop.eup %1480  ;;  %v1109_v49 = vadd.f32 1e-05, %v1093_v31  ;;  %v1165_v4 = vmul.f32 %v1479_v28, %v1164_v51 }
 0x247   :  { %v1159_v58 = vsel %vm1158_vm9, %v1477_v22, %v1155_v5  ;;  %v1241_v8 = vmul.f32 %v1481_v32, %v1116_v61  ;;  %vm1247_vm12 = vweird.f32 %v1481_v32 }
 0x248   :  { %v1283_v45 = vmul.f32 %v1159_v58, %v2326_v17  ;;  %1482 = vrsqrt.f32 %v1109_v49  ;;  %v1169_v50 = vsel %vm1168_vm11, %v1479_v28, %v1165_v4  ;;  %vm1248_vm14 = vmor %vm1246_vm13, %vm1247_vm12  ;;  %vm1176_vm0 = vweird.f32 %v1109_v49 }
 0x249   :  { %v1242_v18 = vmul.f32 %v1481_v32, %v1241_v8  ;;  %v1284_v55 = vmul.f32 %v1169_v50, %v2329_v13 }
 0x24a   :  { %v1303_v54 = vmul.f32 %v2382_v44, %v1283_v45 }
 0x24b   :  { %v1243_v20 = vmul.f32 0.5, %v1242_v18  ;;  %v1304_v12 = vmul.f32 %v2382_v44, %v1284_v55 }
 0x24c   :  { %v1323_v38 = vadd.f32 %v2387_v30, %v1303_v54 }
 0x24d   :  { %v1244_v36 = vsub.f32 1.5, %v1243_v20  ;;  %v1069_v7 = vpop.xlane.xlu1 %1068  ;;  %v1324_v17 = vadd.f32 %v2387_v30, %v1304_v12 }
 0x24e   :  { %v1483_v15 = vpop.eup %1482  ;;  %1339 = vst [vmem:[#allocation7 + $0x18] sm:$0xff] %v1323_v38  ;;  %v1094_v52 = vmul.f32 0.03125, %v1069_v7 }
 0x24f   :  { %v1245_v35 = vmul.f32 %v1481_v32, %v1244_v36  ;;  %v1171_v27 = vmul.f32 %v1483_v15, %v1109_v49  ;;  %1340 = vst [vmem:[#allocation7 + $0x20] sm:$0xff] %v1324_v17  ;;  %vm1177_vm15 = vweird.f32 %v1483_v15 }
 0x250   :  { %v1110_v62 = vadd.f32 1e-05, %v1094_v52  ;;  %vm1178_vm1 = vmor %vm1176_vm0, %vm1177_vm15 }
 0x251   :  { %v1249_v13 = vsel %vm1248_vm14, %v1481_v32, %v1245_v35  ;;  %v1172_v23 = vmul.f32 %v1483_v15, %v1171_v27 }
 0x252   :  { %v1292_v10 = vmul.f32 %v1249_v13, %v2338_v14  ;;  %1484 = vrsqrt.f32 %v1110_v62  ;;  %vm1186_vm3 = vweird.f32 %v1110_v62 }
 0x253   :  { %v1173_v39 = vmul.f32 0.5, %v1172_v23 }
 0x254   :  { %v1312_v47 = vmul.f32 %v2382_v44, %v1292_v10  ;;  %v1085_v34 = vpop.xlane.xlu0 %1084 }
 0x255   :  { %v1174_v63 = vsub.f32 1.5, %v1173_v39  ;;  %v1102_v42 = vmul.f32 0.03125, %v1085_v34 }
 0x256   :  { %v1332_v59 = vadd.f32 %v2387_v30, %v1312_v47 }
 0x257   :  { %v1175_v25 = vmul.f32 %v1483_v15, %v1174_v63  ;;  %v1118_v1 = vadd.f32 1e-05, %v1102_v42 }
 0x258   :  { %v1485_v9 = vpop.eup %1484  ;;  %1348 = vst [vmem:[#allocation7 + $0x60] sm:$0xff] %v1332_v59 }
 0x259   :  { %v1179_v19 = vsel %vm1178_vm1, %v1483_v15, %v1175_v25  ;;  %v1181_v26 = vmul.f32 %v1485_v9, %v1110_v62  ;;  %1486 = vrsqrt.f32 %v1118_v1  ;;  %vm1187_vm2 = vweird.f32 %v1485_v9 }
 0x25a   :  { %v1285_v14 = vmul.f32 %v1179_v19, %v2344_v48  ;;  %vm1188_vm4 = vmor %vm1186_vm3, %vm1187_vm2  ;;  %vm1266_vm6 = vweird.f32 %v1118_v1 }
 0x25b   :  { %v1182_v37 = vmul.f32 %v1485_v9, %v1181_v26 }
 0x25c   :  { %v1305_v11 = vmul.f32 %v2382_v44, %v1285_v14  ;;  %v1071_v22 = vpop.xlane.xlu2 %1070 }
 0x25d   :  { %v1183_v6 = vmul.f32 0.5, %v1182_v37  ;;  %v1095_v41 = vmul.f32 0.03125, %v1071_v22 }
 0x25e   :  { %v1325_v40 = vadd.f32 %v2387_v30, %v1305_v11 }
 0x25f   :  { %v1487_v28 = vpop.eup %1486  ;;  %v1184_v3 = vsub.f32 1.5, %v1183_v6  ;;  %v1111_v61 = vadd.f32 1e-05, %v1095_v41 }
 0x260   :  { %1341 = vst [vmem:[#allocation7 + $0x28] sm:$0xff] %v1325_v40  ;;  %v1261_v53 = vmul.f32 %v1487_v28, %v1118_v1  ;;  %vm1267_vm5 = vweird.f32 %v1487_v28 }
 0x261   :  { %v1185_v29 = vmul.f32 %v1485_v9, %v1184_v3  ;;  %1488 = vrsqrt.f32 %v1111_v61  ;;  %vm1268_vm7 = vmor %vm1266_vm6, %vm1267_vm5  ;;  %vm1196_vm9 = vweird.f32 %v1111_v61 }
 0x262   :  { %v1262_v16 = vmul.f32 %v1487_v28, %v1261_v53 }
 0x263   :  { %v1189_v48 = vsel %vm1188_vm4, %v1485_v9, %v1185_v29 }
 0x264   :  { %v1286_v33 = vmul.f32 %v1189_v48, %v2350_v56  ;;  %v1263_v46 = vmul.f32 0.5, %v1262_v16  ;;  %v1083_v2 = vpop.xlane.xlu2 %1082 }
 0x265   :  { %v1101_v57 = vmul.f32 0.03125, %v1083_v2 }
 0x266   :  { %v1306_v60 = vmul.f32 %v2382_v44, %v1286_v33  ;;  %v1264_v31 = vsub.f32 1.5, %v1263_v46  ;;  %v1087_v5 = vpop.xlane.xlu1 %1086 }
 0x267   :  { %v1489_v51 = vpop.eup %1488  ;;  %v1103_v32 = vmul.f32 0.03125, %v1087_v5  ;;  %v1117_v49 = vadd.f32 1e-05, %v1101_v57 }
 0x268   :  { %v1326_v58 = vadd.f32 %v2387_v30, %v1306_v60  ;;  %v1265_v4 = vmul.f32 %v1487_v28, %v1264_v31  ;;  %v1191_v8 = vmul.f32 %v1489_v51, %v1111_v61  ;;  %vm1197_vm8 = vweird.f32 %v1489_v51 }
 0x269   :  { %v1119_v45 = vadd.f32 1e-05, %v1103_v32  ;;  %1490 = vrsqrt.f32 %v1117_v49  ;;  %vm1198_vm10 = vmor %vm1196_vm9, %vm1197_vm8  ;;  %vm1256_vm13 = vweird.f32 %v1117_v49 }
 0x26a   :  { %1342 = vst [vmem:[#allocation7 + $0x30] sm:$0xff] %v1326_v58  ;;  %v1269_v56 = vsel %vm1268_vm7, %v1487_v28, %v1265_v4  ;;  %v1192_v50 = vmul.f32 %v1489_v51, %v1191_v8 }
 0x26b   :  { %v1294_v18 = vmul.f32 %v1269_v56, %v2356_v21  ;;  %1492 = vrsqrt.f32 %v1119_v45  ;;  %vm1276_vm15 = vweird.f32 %v1119_v45 }
 0x26c   :  { %v1193_v54 = vmul.f32 0.5, %v1192_v50 }
 0x26d   :  { %v1314_v55 = vmul.f32 %v2382_v44, %v1294_v18 }
 0x26e   :  { %v1194_v20 = vsub.f32 1.5, %v1193_v54 }
 0x26f   :  { %v1491_v38 = vpop.eup %1490  ;;  %v1334_v12 = vadd.f32 %v2387_v30, %v1314_v55 }
 0x270   :  { %v1195_v36 = vmul.f32 %v1489_v51, %v1194_v20  ;;  %v1251_v7 = vmul.f32 %v1491_v38, %v1117_v49  ;;  %vm1257_vm11 = vweird.f32 %v1491_v38 }
 0x271   :  { %v1493_v15 = vpop.eup %1492  ;;  %1350 = vst [vmem:[#allocation7 + $0x70] sm:$0xff] %v1334_v12  ;;  %vm1258_vm14 = vmor %vm1256_vm13, %vm1257_vm11 }
 0x272   :  { %v1199_v17 = vsel %vm1198_vm10, %v1489_v51, %v1195_v36  ;;  %v1271_v52 = vmul.f32 %v1493_v15, %v1119_v45  ;;  %v1252_v35 = vmul.f32 %v1491_v38, %v1251_v7  ;;  %vm1277_vm12 = vweird.f32 %v1493_v15 }
 0x273   :  { %v1287_v21 = vmul.f32 %v1199_v17, %v2362_v43  ;;  %vm1278_vm0 = vmor %vm1276_vm15, %vm1277_vm12 }
 0x274   :  { %v1272_v27 = vmul.f32 %v1493_v15, %v1271_v52  ;;  %v1253_v62 = vmul.f32 0.5, %v1252_v35 }
 0x275   :  { %v1307_v13 = vmul.f32 %v2382_v44, %v1287_v21 }
 0x276   :  { %v1273_v23 = vmul.f32 0.5, %v1272_v27  ;;  %v1254_v10 = vsub.f32 1.5, %v1253_v62 }
 0x277   :  { %v1327_v39 = vadd.f32 %v2387_v30, %v1307_v13 }
 0x278   :  { %v1274_v47 = vsub.f32 1.5, %v1273_v23  ;;  %v1255_v34 = vmul.f32 %v1491_v38, %v1254_v10 }
 0x279   :  { %1343 = vst [vmem:[#allocation7 + $0x38] sm:$0xff] %v1327_v39 }
 0x27a   :  { %v1275_v63 = vmul.f32 %v1493_v15, %v1274_v47  ;;  %v1259_v42 = vsel %vm1258_vm14, %v1491_v38, %v1255_v34 }
 0x27b   :  { %v1293_v43 = vmul.f32 %v1259_v42, %v2368_v0 }
 0x27c   :  { %v1279_v59 = vsel %vm1278_vm0, %v1493_v15, %v1275_v63 }
 0x27d   :  { %v1295_v25 = vmul.f32 %v1279_v59, %v2374_v24  ;;  %v1313_v1 = vmul.f32 %v2382_v44, %v1293_v43 }
 0x27f   :  { %v1315_v9 = vmul.f32 %v2382_v44, %v1295_v25  ;;  %v1333_v19 = vadd.f32 %v2387_v30, %v1313_v1 }
 0x281   :  { %v1335_v26 = vadd.f32 %v2387_v30, %v1315_v9  ;;  %1349 = vst [vmem:[#allocation7 + $0x68] sm:$0xff] %v1333_v19 }
 0x283   :  { %1351 = vst [vmem:[#allocation7 + $0x78] sm:$0xff] %v1335_v26 }
 0x284   :  { %1364 = dma.vmem_to_hbm [thread:$0]  %s1357_s4, 2048, %s1359_s12, [#allocation4], %s1576_s30, %s1576_s30, %s1577_s6  }
 0x285   :  { %1570 = dma.done.wait [#allocation4], 2048  }
 0x286   :  { %1571 = vsyncadd [#allocation4], 4294965248 }
 0x287   :  { %1369 = vsyncpa [#allocation3], 1 }
 0x288   :  { %1370 = vsyncpa [#allocation6], 1 }
 0x289   :  { %1371 = vsyncpa [#allocation4], 1 }

</bundles_post_ra>
